<compile_context>
chip_gen: v7x
topology: tpu7x:2x2x1
jax: 0.10.0
libtpu: 0.0.40
codegen_flags: <defaults>
</compile_context>

<pallas_src>
import functools

import jax
import jax.numpy as jnp
import numpy as np
from jax.experimental import pallas as pl
from jax.experimental.pallas import tpu as pltpu


# ----------------------------------------------------------------------------
# Kernel
# ----------------------------------------------------------------------------
def vae_forward_kernel(
    # packed data slab: [feature | label | eps_l | eps_f | 0...]  (T, IN_PAD)
    in_ref,
    # fused input matmul  [feat|label] -> [fe1_pre | fx1_pre | fd1_base]
    in_w_ref, in_b_ref,
    # label-branch encoder layer 2
    fe2_w_ref, fe2_b_ref,
    # feature-branch encoder layers 2/3
    fx2_w_ref, fx2_b_ref,
    fx3_w_ref, fx3_b_ref,
    # split block-diagonal mu/logvar head (columns already at output lanes)
    mlv_wt_ref, mlv_wb_ref, mlv_b_ref,
    # decoder: z-part of fd_x1, then fd_x2
    fdz_w_ref,
    fd2_w_ref, fd2_b_ref,
    # packed decoder heads: label head at lanes [0:L), feature head at [L:2L)
    head_w_ref, head_b_ref,
    # packed output slab  (T, OUT_PAD)
    out_ref,
    *, feature_dim, label_dim, latent_dim, scale_coeff,
):
    F, L, Z = feature_dim, label_dim, latent_dim
    bf16 = jnp.bfloat16

    def mm(x_bf16, w_ref):
        # bf16 x bf16 matmul with f32 accumulation on the MXU.
        return jnp.dot(x_bf16, w_ref[...], preferred_element_type=jnp.float32)

    relu = lambda v: jnp.maximum(v, 0.0)

    in_slab = in_ref[...]                                   # (T, IN_PAD) f32
    T = in_slab.shape[0]

    # Cast the matmul-feeding part of the inputs to bf16 ONCE.
    xcat = in_slab[:, 0:F + L].astype(bf16)                 # [feat | label]
    eps = in_slab[:, F + L:F + L + 2 * Z]                   # [eps_l | eps_f] (f32)

    n_fe1 = fe2_w_ref.shape[0]                              # 512
    n_fx1 = fx2_w_ref.shape[0]                              # 256

    # ---------------- fused input matmul (3 skinny-K matmuls -> 1) ----------
    pre = mm(xcat, in_w_ref) + in_b_ref[...]                # (T, 1024) f32
    h1 = relu(pre[:, 0:n_fe1]).astype(bf16)                 # fe1 output
    g1 = relu(pre[:, n_fe1:n_fe1 + n_fx1]).astype(bf16)     # fx1 output
    base = pre[:, n_fe1 + n_fx1:]                           # fd_x1 feat-part + bias (no relu yet)

    # ---------------- encoders ----------------
    h2 = relu(mm(h1, fe2_w_ref) + fe2_b_ref[...]).astype(bf16)   # (T, 256)
    g2 = relu(mm(g1, fx2_w_ref) + fx2_b_ref[...]).astype(bf16)   # (T, 512)
    g3 = relu(mm(g2, fx3_w_ref) + fx3_b_ref[...]).astype(bf16)   # (T, 256)

    # Block-diagonal mu/logvar head without a lane concat; scale_coeff applied
    # to the f32 accumulator.  Columns already sit at their output-slab lanes:
    #   [0..2L) zeros | l_mu | f_mu | l_lv | f_lv | zeros ...
    mlv = mm(h2, mlv_wt_ref) + mm(g3, mlv_wb_ref) + mlv_b_ref[...]     # (T, OUT_PAD)
    if scale_coeff != 1.0:
        mlv = mlv * scale_coeff

    # ---------------- reparameterization (both branches at once) ------------
    mu = mlv[:, 2 * L:2 * L + 2 * Z]                        # [l_mu | f_mu]
    lv = mlv[:, 2 * L + 2 * Z:2 * L + 4 * Z]                # [l_lv | f_lv]
    z_both = mu + eps * jnp.exp(0.5 * lv)                   # (T, 2Z) f32
    z_stack = jnp.concatenate([z_both[:, :Z], z_both[:, Z:]],
                              axis=0).astype(bf16)          # (2T, Z)

    # ---------------- shared decoder trunk ----------------
    dz = mm(z_stack, fdz_w_ref)                             # (2T, 256) f32
    # add the shared `base` via broadcast instead of concatenating it twice
    d_stack = relu(dz.reshape(2, T, -1) + base[None, :, :]
                   ).astype(bf16).reshape(2 * T, -1)        # (2T, 256)
    h_stack = relu(mm(d_stack, fd2_w_ref) + fd2_b_ref[...]).astype(bf16)  # (2T, 512)

    # ---------------- packed decoder heads + packed output slab -------------
    # head_w has lmp at lanes [0:L) and fmp at [L:2L); everything else zero.
    heads = mm(h_stack, head_w_ref) + head_b_ref[...]       # (2T, OUT_PAD) f32
    lane = jax.lax.broadcasted_iota(jnp.int32, (T, heads.shape[1]), 1)
    # lanes [0:L) from the label-branch rows, lanes >= L from the feat-branch
    # rows (zero beyond 2L); mlv is zero in [0:2L) -> plain add completes the slab.
    out = jnp.where(lane < L, heads[:T], heads[T:]) + mlv
    out_ref[...] = out.astype(out_ref.dtype)


# ----------------------------------------------------------------------------
# Parameter construction (deterministic, PyTorch-Linear style shapes)
# ----------------------------------------------------------------------------
def make_linear(key, in_dim, out_dim):
    """Kaiming-uniform-ish deterministic init; returns W^T (in,out) and b (1,out)."""
    kw, kb = jax.random.split(key)
    bound = 1.0 / np.sqrt(in_dim)
    w = jax.random.uniform(kw, (in_dim, out_dim), jnp.float32, -bound, bound)
    b = jax.random.uniform(kb, (1, out_dim), jnp.float32, -bound, bound)
    return w, b


def make_params(key, feature_dim, label_dim, latent_dim):
    names_dims = [
        ("fx1", feature_dim, 256),
        ("fx2", 256, 512),
        ("fx3", 512, 256),
        ("fx_mu", 256, latent_dim),
        ("fx_logvar", 256, latent_dim),
        ("fd_x1", feature_dim + latent_dim, 256),
        ("fd_x2", 256, 512),
        ("feat_mp_mu", 512, label_dim),
        ("fe1", feature_dim + label_dim, 512),
        ("fe2", 512, 256),
        ("fe_mu", 256, latent_dim),
        ("fe_logvar", 256, latent_dim),
        ("label_mp_mu", 512, label_dim),
    ]
    keys = jax.random.split(key, len(names_dims))
    params = {}
    for k, (name, din, dout) in zip(keys, names_dims):
        params[name] = make_linear(k, din, dout)
    return params
    # TODO(synk): r_sqrt_sigma is registered in __init__ but unused in forward(); omitted.


# ----------------------------------------------------------------------------
# Wrapper
# ----------------------------------------------------------------------------
def _round_up(x, m):
    return ((x + m - 1) // m) * m


def _prep_weights(params, *, feature_dim, label_dim, latent_dim, out_pad,
                  wdtype=jnp.bfloat16):
    """Transform PyTorch-style params into the kernel's fused/packed bf16 form."""
    F, L, Z = feature_dim, label_dim, latent_dim
    f32 = jnp.float32
    wc = lambda w: w.astype(wdtype)

    fe1_w, fe1_b = params["fe1"]          # (F+L, 512) — rows ordered [feat|label]
    fx1_w, fx1_b = params["fx1"]          # (F, 256)
    fd1_w, fd1_b = params["fd_x1"]        # (F+Z, 256)
    fe2_w, fe2_b = params["fe2"]
    fx2_w, fx2_b = params["fx2"]
    fx3_w, fx3_b = params["fx3"]
    fe_mu_w, fe_mu_b = params["fe_mu"]
    fe_lv_w, fe_lv_b = params["fe_logvar"]
    fx_mu_w, fx_mu_b = params["fx_mu"]
    fx_lv_w, fx_lv_b = params["fx_logvar"]
    fd2_w, fd2_b = params["fd_x2"]
    lmp_w, lmp_b = params["label_mp_mu"]
    fmp_w, fmp_b = params["feat_mp_mu"]

    n_fe1 = fe1_w.shape[1]   # 512
    n_fx1 = fx1_w.shape[1]   # 256
    n_fd1 = fd1_w.shape[1]   # 256

    # Fused input matmul: [feat|label] @ W_in -> [fe1_pre | fx1_pre | fd1_base].
    w_in = jnp.zeros((F + L, n_fe1 + n_fx1 + n_fd1), f32)
    w_in = w_in.at[:, :n_fe1].set(fe1_w)
    w_in = w_in.at[:F, n_fe1:n_fe1 + n_fx1].set(fx1_w)
    w_in = w_in.at[:F, n_fe1 + n_fx1:].set(fd1_w[:F])
    b_in = jnp.concatenate([fe1_b, fx1_b, fd1_b], axis=1)

    # Split block-diagonal mu/logvar head; columns placed directly at their
    # output-slab lanes [2L .. 2L+4Z) ordered [l_mu | f_mu | l_lv | f_lv].
    # scale_coeff is NOT folded into these bf16 weights (applied in f32 in-kernel).
    off = 2 * L
    w_mlv_top = jnp.zeros((fe_mu_w.shape[0], out_pad), f32)
    w_mlv_top = w_mlv_top.at[:, off:off + Z].set(fe_mu_w)
    w_mlv_top = w_mlv_top.at[:, off + 2 * Z:off + 3 * Z].set(fe_lv_w)
    w_mlv_bot = jnp.zeros((fx_mu_w.shape[0], out_pad), f32)
    w_mlv_bot = w_mlv_bot.at[:, off + Z:off + 2 * Z].set(fx_mu_w)
    w_mlv_bot = w_mlv_bot.at[:, off + 3 * Z:off + 4 * Z].set(fx_lv_w)
    b_mlv = jnp.zeros((1, out_pad), f32)
    b_mlv = b_mlv.at[:, off:off + Z].set(fe_mu_b)
    b_mlv = b_mlv.at[:, off + Z:off + 2 * Z].set(fx_mu_b)
    b_mlv = b_mlv.at[:, off + 2 * Z:off + 3 * Z].set(fe_lv_b)
    b_mlv = b_mlv.at[:, off + 3 * Z:off + 4 * Z].set(fx_lv_b)

    # Packed decoder heads: label head at lanes [0:L), feature head at [L:2L).
    w_heads = jnp.zeros((fd2_w.shape[1], out_pad), f32)
    w_heads = w_heads.at[:, :L].set(lmp_w)
    w_heads = w_heads.at[:, L:2 * L].set(fmp_w)
    b_heads = jnp.zeros((1, out_pad), f32)
    b_heads = b_heads.at[:, :L].set(lmp_b)
    b_heads = b_heads.at[:, L:2 * L].set(fmp_b)

    # Order must match the kernel signature.
    return [
        wc(w_in), b_in,
        wc(fe2_w), fe2_b,
        wc(fx2_w), fx2_b,
        wc(fx3_w), fx3_b,
        wc(w_mlv_top), wc(w_mlv_bot), b_mlv,
        wc(fd1_w[F:]),                       # z-part of fd_x1
        wc(fd2_w), fd2_b,
        wc(w_heads), b_heads,
    ]


def vae_forward(label, feature, eps_l, eps_f, params, *, scale_coeff,
                feature_dim, label_dim, latent_dim, tile_b=512):
    B = label.shape[0]
    F, L, Z = feature_dim, label_dim, latent_dim
    f32 = jnp.float32

    # --- batch tiling -------------------------------------------------------
    # The batch (M) dim streams through the MXU, so big tiles are fine on every
    # chip (including v5e); larger tiles amortize the ~0.35 us per-grid-step cost.
    TILE_B = min(tile_b, _round_up(B, 8))
    nb = _round_up(B, TILE_B) // TILE_B
    # v7x: keep >= 2 batch tiles when the batch is large enough to split so
    # both TensorCores get work under dimension_semantics=("parallel",).
    if nb < 2 and B > 16:
        TILE_B = _round_up((B + 1) // 2, 8)
    B_pad = _round_up(B, TILE_B)
    nb = B_pad // TILE_B

    # --- pack all batch-tiled inputs into ONE lane-dense slab ---------------
    IN_PAD = _round_up(F + L + 2 * Z, 128)
    packed_in = jnp.concatenate([feature, label, eps_l, eps_f], axis=1)
    in_slab = jnp.pad(packed_in,
                      ((0, B_pad - B), (0, IN_PAD - packed_in.shape[1])))

    # --- packed output slab: [label_out | feat_out | l_mu | f_mu | l_lv | f_lv | 0..]
    OUT_PAD = _round_up(2 * L + 4 * Z, 128)

    weights = _prep_weights(params, feature_dim=F, label_dim=L, latent_dim=Z,
                            out_pad=OUT_PAD)

    in_specs = [pl.BlockSpec((TILE_B, IN_PAD), lambda i: (i, 0))]
    # Constant index_map -> weights stay VMEM-resident across all batch tiles.
    in_specs += [pl.BlockSpec(w.shape, lambda i: (0, 0)) for w in weights]

    out_shape = jax.ShapeDtypeStruct((B_pad, OUT_PAD), f32)
    out_specs = pl.BlockSpec((TILE_B, OUT_PAD), lambda i: (i, 0))

    kernel = functools.partial(vae_forward_kernel, feature_dim=F, label_dim=L,
                               latent_dim=Z, scale_coeff=float(scale_coeff))

    out = pl.pallas_call(
        kernel,
        out_shape=out_shape,
        grid_spec=pltpu.PrefetchScalarGridSpec(
            num_scalar_prefetch=0,
            grid=(nb,),
            in_specs=in_specs,
            out_specs=out_specs,
        ),
        compiler_params=pltpu.CompilerParams(
            dimension_semantics=("parallel",),
            # ~1.3 MiB bf16 weights + <~12 MiB f32 intermediates even at
            # TILE_B=512; 48 MiB stays under the 64 MiB physical VMEM of v7x
            # and well under the 128 MiB of v5e/v6e.
            vmem_limit_bytes=48 * 1024 * 1024,
        ),
    )(in_slab, *weights)

    label_out = out[:B, 0:L]
    feat_out = out[:B, L:2 * L]
    base = 2 * L
    label_mu = out[:B, base:base + Z]
    feat_mu = out[:B, base + Z:base + 2 * Z]
    label_logvar = out[:B, base + 2 * Z:base + 3 * Z]
    feat_logvar = out[:B, base + 3 * Z:base + 4 * Z]
    return label_out, label_mu, label_logvar, feat_out, feat_mu, feat_logvar


# ----------------------------------------------------------------------------
# Pure-JAX reference (f32, mirrors the PyTorch forward; for correctness check)
# ----------------------------------------------------------------------------
def vae_forward_ref(label, feature, eps_l, eps_f, params, *, scale_coeff):
    def lin(name, x):
        w, b = params[name]
        return x @ w + b

    relu = lambda v: jnp.maximum(v, 0.0)

    # label_forward
    x = jnp.concatenate([feature, label], axis=1)
    h1 = relu(lin("fe1", x))
    h2 = relu(lin("fe2", h1))
    l_mu = lin("fe_mu", h2) * scale_coeff
    l_lv = lin("fe_logvar", h2) * scale_coeff
    z_l = l_mu + eps_l * jnp.exp(0.5 * l_lv)
    d = jnp.concatenate([feature, z_l], axis=1)
    d3 = relu(lin("fd_x1", d))
    d4 = relu(lin("fd_x2", d3))
    label_out = lin("label_mp_mu", d4)

    # feat_forward
    g1 = relu(lin("fx1", feature))
    g2 = relu(lin("fx2", g1))
    g3 = relu(lin("fx3", g2))
    f_mu = lin("fx_mu", g3) * scale_coeff
    f_lv = lin("fx_logvar", g3) * scale_coeff
    z_f = f_mu + eps_f * jnp.exp(0.5 * f_lv)
    e = jnp.concatenate([feature, z_f], axis=1)
    e4 = relu(lin("fd_x1", e))
    e5 = relu(lin("fd_x2", e4))
    feat_out = lin("feat_mp_mu", e5)

    return label_out, l_mu, l_lv, feat_out, f_mu, f_lv


# ----------------------------------------------------------------------------
# Main
# ----------------------------------------------------------------------------
if __name__ == "__main__":
    feature_dim = 16
    label_dim = 8
    latent_dim = 8
    scale_coeff = 1.0

    root = jax.random.PRNGKey(0)
    (k_params, k_label, k_feat, k_el, k_ef,
     k_label2, k_feat2, k_el2, k_ef2) = jax.random.split(root, 9)

    params = make_params(k_params, feature_dim, label_dim, latent_dim)

    def make_inputs(B, kl, kf, kel, kef):
        lbl = (jax.random.uniform(kl, (B, label_dim)) > 0.5).astype(jnp.float32)
        ft = jax.random.normal(kf, (B, feature_dim), jnp.float32)
        el = jax.random.normal(kel, (B, latent_dim), jnp.float32)
        ef = jax.random.normal(kef, (B, latent_dim), jnp.float32)
        return lbl, ft, el, ef

    def check(B, kl, kf, kel, kef):
        lbl, ft, el, ef = make_inputs(B, kl, kf, kel, kef)
        outs = vae_forward(lbl, ft, el, ef, params,
                           scale_coeff=scale_coeff, feature_dim=feature_dim,
                           label_dim=label_dim, latent_dim=latent_dim)
        outs = jax.block_until_ready(outs)
        refs = vae_forward_ref(lbl, ft, el, ef, params, scale_coeff=scale_coeff)
        # bf16 matmul operands (f32 accumulation) -> loosened tolerance vs f32 ref.
        for o, r in zip(outs, refs):
            np.testing.assert_allclose(np.asarray(o), np.asarray(r),
                                       rtol=5e-2, atol=5e-2)

    # Required small-shape run (B=2, module-consistent dims).
    check(2, k_label, k_feat, k_el, k_ef)
    # Exercise the batch grid: ragged batch split into 2 parallel tiles.
    check(300, k_label2, k_feat2, k_el2, k_ef2)

    print("KERNEL_OK")
</pallas_src>

<mosaic_0001>
module attributes {stable_mosaic.version = 11 : i64} {
  func.func @vae_forward_kernel(%arg0: i32, %arg1: memref<8x128xf32, #tpu.memory_space<vmem>>, %arg2: memref<24x1024xbf16, #tpu.memory_space<vmem>>, %arg3: memref<1x1024xf32, #tpu.memory_space<vmem>>, %arg4: memref<512x256xbf16, #tpu.memory_space<vmem>>, %arg5: memref<1x256xf32, #tpu.memory_space<vmem>>, %arg6: memref<256x512xbf16, #tpu.memory_space<vmem>>, %arg7: memref<1x512xf32, #tpu.memory_space<vmem>>, %arg8: memref<512x256xbf16, #tpu.memory_space<vmem>>, %arg9: memref<1x256xf32, #tpu.memory_space<vmem>>, %arg10: memref<256x128xbf16, #tpu.memory_space<vmem>>, %arg11: memref<256x128xbf16, #tpu.memory_space<vmem>>, %arg12: memref<1x128xf32, #tpu.memory_space<vmem>>, %arg13: memref<8x256xbf16, #tpu.memory_space<vmem>>, %arg14: memref<256x512xbf16, #tpu.memory_space<vmem>>, %arg15: memref<1x512xf32, #tpu.memory_space<vmem>>, %arg16: memref<512x128xbf16, #tpu.memory_space<vmem>>, %arg17: memref<1x128xf32, #tpu.memory_space<vmem>>, %arg18: memref<8x128xf32, #tpu.memory_space<vmem>>) attributes {dimension_semantics = [#tpu.dimension_semantics<parallel>], iteration_bounds = array<i64: 1>, scalar_prefetch = 0 : i64, scratch_operands = 0 : i64, tpu.core_type = #tpu.core_type<tc>, window_params = [{transform_indices = @transform_0, window_bounds = array<i64: 8, 128>}, {pipeline_mode = #tpu.pipeline_mode<synchronous>, transform_indices = @transform_1, window_bounds = array<i64: 24, 1024>}, {pipeline_mode = #tpu.pipeline_mode<synchronous>, transform_indices = @transform_2, window_bounds = array<i64: 1, 1024>}, {pipeline_mode = #tpu.pipeline_mode<synchronous>, transform_indices = @transform_3, window_bounds = array<i64: 512, 256>}, {pipeline_mode = #tpu.pipeline_mode<synchronous>, transform_indices = @transform_4, window_bounds = array<i64: 1, 256>}, {pipeline_mode = #tpu.pipeline_mode<synchronous>, transform_indices = @transform_5, window_bounds = array<i64: 256, 512>}, {pipeline_mode = #tpu.pipeline_mode<synchronous>, transform_indices = @transform_6, window_bounds = array<i64: 1, 512>}, {pipeline_mode = #tpu.pipeline_mode<synchronous>, transform_indices = @transform_7, window_bounds = array<i64: 512, 256>}, {pipeline_mode = #tpu.pipeline_mode<synchronous>, transform_indices = @transform_8, window_bounds = array<i64: 1, 256>}, {pipeline_mode = #tpu.pipeline_mode<synchronous>, transform_indices = @transform_9, window_bounds = array<i64: 256, 128>}, {pipeline_mode = #tpu.pipeline_mode<synchronous>, transform_indices = @transform_10, window_bounds = array<i64: 256, 128>}, {pipeline_mode = #tpu.pipeline_mode<synchronous>, transform_indices = @transform_11, window_bounds = array<i64: 1, 128>}, {pipeline_mode = #tpu.pipeline_mode<synchronous>, transform_indices = @transform_12, window_bounds = array<i64: 8, 256>}, {pipeline_mode = #tpu.pipeline_mode<synchronous>, transform_indices = @transform_13, window_bounds = array<i64: 256, 512>}, {pipeline_mode = #tpu.pipeline_mode<synchronous>, transform_indices = @transform_14, window_bounds = array<i64: 1, 512>}, {pipeline_mode = #tpu.pipeline_mode<synchronous>, transform_indices = @transform_15, window_bounds = array<i64: 512, 128>}, {pipeline_mode = #tpu.pipeline_mode<synchronous>, transform_indices = @transform_16, window_bounds = array<i64: 1, 128>}, {transform_indices = @transform_17, window_bounds = array<i64: 8, 128>}]} {
    %c0 = arith.constant 0 : index
    %c0_0 = arith.constant 0 : index
    %0 = vector.load %arg1[%c0, %c0_0] : memref<8x128xf32, #tpu.memory_space<vmem>>, vector<8x128xf32>
    %1 = vector.extract_strided_slice %0 {offsets = [0, 0], sizes = [8, 24], strides = [1, 1]} : vector<8x128xf32> to vector<8x24xf32>
    %2 = arith.truncf %1 : vector<8x24xf32> to vector<8x24xbf16>
    %3 = vector.extract_strided_slice %0 {offsets = [0, 24], sizes = [8, 16], strides = [1, 1]} : vector<8x128xf32> to vector<8x16xf32>
    %c0_1 = arith.constant 0 : index
    %c0_2 = arith.constant 0 : index
    %4 = vector.load %arg2[%c0_1, %c0_2] : memref<24x1024xbf16, #tpu.memory_space<vmem>>, vector<24x1024xbf16>
    %cst = arith.constant dense<0.000000e+00> : vector<8x1024xf32>
    %5 = tpu.matmul %2, %4, %cst {dimension_numbers = #tpu.dot_dimension_numbers<[1], [0], [0], [1], [0, 0, 1, 1], [], []>} : vector<8x24xbf16>, vector<24x1024xbf16>, vector<8x1024xf32> -> vector<8x1024xf32>
    %c0_3 = arith.constant 0 : index
    %c0_4 = arith.constant 0 : index
    %6 = vector.load %arg3[%c0_3, %c0_4] : memref<1x1024xf32, #tpu.memory_space<vmem>>, vector<1x1024xf32>
    %7 = vector.broadcast %6 : vector<1x1024xf32> to vector<8x1024xf32>
    %8 = arith.addf %5, %7 : vector<8x1024xf32>
    %9 = vector.extract_strided_slice %8 {offsets = [0, 0], sizes = [8, 512], strides = [1, 1]} : vector<8x1024xf32> to vector<8x512xf32>
    %cst_5 = arith.constant 0.000000e+00 : f32
    %10 = vector.broadcast %cst_5 : f32 to vector<8x512xf32>
    %11 = arith.maximumf %9, %10 : vector<8x512xf32>
    %12 = arith.truncf %11 : vector<8x512xf32> to vector<8x512xbf16>
    %13 = vector.extract_strided_slice %8 {offsets = [0, 512], sizes = [8, 256], strides = [1, 1]} : vector<8x1024xf32> to vector<8x256xf32>
    %cst_6 = arith.constant 0.000000e+00 : f32
    %14 = vector.broadcast %cst_6 : f32 to vector<8x256xf32>
    %15 = arith.maximumf %13, %14 : vector<8x256xf32>
    %16 = arith.truncf %15 : vector<8x256xf32> to vector<8x256xbf16>
    %17 = vector.extract_strided_slice %8 {offsets = [0, 768], sizes = [8, 256], strides = [1, 1]} : vector<8x1024xf32> to vector<8x256xf32>
    %c0_7 = arith.constant 0 : index
    %c0_8 = arith.constant 0 : index
    %18 = vector.load %arg4[%c0_7, %c0_8] : memref<512x256xbf16, #tpu.memory_space<vmem>>, vector<512x256xbf16>
    %cst_9 = arith.constant dense<0.000000e+00> : vector<8x256xf32>
    %19 = tpu.matmul %12, %18, %cst_9 {dimension_numbers = #tpu.dot_dimension_numbers<[1], [0], [0], [1], [0, 0, 1, 1], [], []>} : vector<8x512xbf16>, vector<512x256xbf16>, vector<8x256xf32> -> vector<8x256xf32>
    %c0_10 = arith.constant 0 : index
    %c0_11 = arith.constant 0 : index
    %20 = vector.load %arg5[%c0_10, %c0_11] : memref<1x256xf32, #tpu.memory_space<vmem>>, vector<1x256xf32>
    %21 = vector.broadcast %20 : vector<1x256xf32> to vector<8x256xf32>
    %22 = arith.addf %19, %21 : vector<8x256xf32>
    %cst_12 = arith.constant 0.000000e+00 : f32
    %23 = vector.broadcast %cst_12 : f32 to vector<8x256xf32>
    %24 = arith.maximumf %22, %23 : vector<8x256xf32>
    %25 = arith.truncf %24 : vector<8x256xf32> to vector<8x256xbf16>
    %c0_13 = arith.constant 0 : index
    %c0_14 = arith.constant 0 : index
    %26 = vector.load %arg6[%c0_13, %c0_14] : memref<256x512xbf16, #tpu.memory_space<vmem>>, vector<256x512xbf16>
    %cst_15 = arith.constant dense<0.000000e+00> : vector<8x512xf32>
    %27 = tpu.matmul %16, %26, %cst_15 {dimension_numbers = #tpu.dot_dimension_numbers<[1], [0], [0], [1], [0, 0, 1, 1], [], []>} : vector<8x256xbf16>, vector<256x512xbf16>, vector<8x512xf32> -> vector<8x512xf32>
    %c0_16 = arith.constant 0 : index
    %c0_17 = arith.constant 0 : index
    %28 = vector.load %arg7[%c0_16, %c0_17] : memref<1x512xf32, #tpu.memory_space<vmem>>, vector<1x512xf32>
    %29 = vector.broadcast %28 : vector<1x512xf32> to vector<8x512xf32>
    %30 = arith.addf %27, %29 : vector<8x512xf32>
    %cst_18 = arith.constant 0.000000e+00 : f32
    %31 = vector.broadcast %cst_18 : f32 to vector<8x512xf32>
    %32 = arith.maximumf %30, %31 : vector<8x512xf32>
    %33 = arith.truncf %32 : vector<8x512xf32> to vector<8x512xbf16>
    %c0_19 = arith.constant 0 : index
    %c0_20 = arith.constant 0 : index
    %34 = vector.load %arg8[%c0_19, %c0_20] : memref<512x256xbf16, #tpu.memory_space<vmem>>, vector<512x256xbf16>
    %cst_21 = arith.constant dense<0.000000e+00> : vector<8x256xf32>
    %35 = tpu.matmul %33, %34, %cst_21 {dimension_numbers = #tpu.dot_dimension_numbers<[1], [0], [0], [1], [0, 0, 1, 1], [], []>} : vector<8x512xbf16>, vector<512x256xbf16>, vector<8x256xf32> -> vector<8x256xf32>
    %c0_22 = arith.constant 0 : index
    %c0_23 = arith.constant 0 : index
    %36 = vector.load %arg9[%c0_22, %c0_23] : memref<1x256xf32, #tpu.memory_space<vmem>>, vector<1x256xf32>
    %37 = vector.broadcast %36 : vector<1x256xf32> to vector<8x256xf32>
    %38 = arith.addf %35, %37 : vector<8x256xf32>
    %cst_24 = arith.constant 0.000000e+00 : f32
    %39 = vector.broadcast %cst_24 : f32 to vector<8x256xf32>
    %40 = arith.maximumf %38, %39 : vector<8x256xf32>
    %41 = arith.truncf %40 : vector<8x256xf32> to vector<8x256xbf16>
    %c0_25 = arith.constant 0 : index
    %c0_26 = arith.constant 0 : index
    %42 = vector.load %arg10[%c0_25, %c0_26] : memref<256x128xbf16, #tpu.memory_space<vmem>>, vector<256x128xbf16>
    %cst_27 = arith.constant dense<0.000000e+00> : vector<8x128xf32>
    %43 = tpu.matmul %25, %42, %cst_27 {dimension_numbers = #tpu.dot_dimension_numbers<[1], [0], [0], [1], [0, 0, 1, 1], [], []>} : vector<8x256xbf16>, vector<256x128xbf16>, vector<8x128xf32> -> vector<8x128xf32>
    %c0_28 = arith.constant 0 : index
    %c0_29 = arith.constant 0 : index
    %44 = vector.load %arg11[%c0_28, %c0_29] : memref<256x128xbf16, #tpu.memory_space<vmem>>, vector<256x128xbf16>
    %cst_30 = arith.constant dense<0.000000e+00> : vector<8x128xf32>
    %45 = tpu.matmul %41, %44, %cst_30 {dimension_numbers = #tpu.dot_dimension_numbers<[1], [0], [0], [1], [0, 0, 1, 1], [], []>} : vector<8x256xbf16>, vector<256x128xbf16>, vector<8x128xf32> -> vector<8x128xf32>
    %46 = arith.addf %43, %45 : vector<8x128xf32>
    %c0_31 = arith.constant 0 : index
    %c0_32 = arith.constant 0 : index
    %47 = vector.load %arg12[%c0_31, %c0_32] : memref<1x128xf32, #tpu.memory_space<vmem>>, vector<1x128xf32>
    %48 = vector.broadcast %47 : vector<1x128xf32> to vector<8x128xf32>
    %49 = arith.addf %46, %48 : vector<8x128xf32>
    %50 = vector.extract_strided_slice %49 {offsets = [0, 16], sizes = [8, 16], strides = [1, 1]} : vector<8x128xf32> to vector<8x16xf32>
    %51 = vector.extract_strided_slice %49 {offsets = [0, 32], sizes = [8, 16], strides = [1, 1]} : vector<8x128xf32> to vector<8x16xf32>
    %cst_33 = arith.constant 5.000000e-01 : f32
    %52 = vector.broadcast %cst_33 : f32 to vector<8x16xf32>
    %53 = arith.mulf %52, %51 : vector<8x16xf32>
    %54 = math.exp %53 : vector<8x16xf32>
    %55 = arith.mulf %3, %54 : vector<8x16xf32>
    %56 = arith.addf %50, %55 : vector<8x16xf32>
    %57 = vector.extract_strided_slice %56 {offsets = [0, 0], sizes = [8, 8], strides = [1, 1]} : vector<8x16xf32> to vector<8x8xf32>
    %58 = vector.extract_strided_slice %56 {offsets = [0, 8], sizes = [8, 8], strides = [1, 1]} : vector<8x16xf32> to vector<8x8xf32>
    %59 = tpu.concatenate %57, %58 in 0 : vector<8x8xf32>, vector<8x8xf32> -> vector<16x8xf32>
    %60 = arith.truncf %59 : vector<16x8xf32> to vector<16x8xbf16>
    %c0_34 = arith.constant 0 : index
    %c0_35 = arith.constant 0 : index
    %61 = vector.load %arg13[%c0_34, %c0_35] : memref<8x256xbf16, #tpu.memory_space<vmem>>, vector<8x256xbf16>
    %cst_36 = arith.constant dense<0.000000e+00> : vector<16x256xf32>
    %62 = tpu.matmul %60, %61, %cst_36 {dimension_numbers = #tpu.dot_dimension_numbers<[1], [0], [0], [1], [0, 0, 1, 1], [], []>} : vector<16x8xbf16>, vector<8x256xbf16>, vector<16x256xf32> -> vector<16x256xf32>
    %63 = vector.shape_cast %62 : vector<16x256xf32> to vector<2x8x256xf32>
    %64 = vector.shape_cast %17 : vector<8x256xf32> to vector<1x8x256xf32>
    %65 = vector.broadcast %64 : vector<1x8x256xf32> to vector<2x8x256xf32>
    %66 = arith.addf %63, %65 : vector<2x8x256xf32>
    %cst_37 = arith.constant 0.000000e+00 : f32
    %67 = vector.broadcast %cst_37 : f32 to vector<2x8x256xf32>
    %68 = arith.maximumf %66, %67 : vector<2x8x256xf32>
    %69 = arith.truncf %68 : vector<2x8x256xf32> to vector<2x8x256xbf16>
    %70 = vector.shape_cast %69 : vector<2x8x256xbf16> to vector<16x256xbf16>
    %c0_38 = arith.constant 0 : index
    %c0_39 = arith.constant 0 : index
    %71 = vector.load %arg14[%c0_38, %c0_39] : memref<256x512xbf16, #tpu.memory_space<vmem>>, vector<256x512xbf16>
    %cst_40 = arith.constant dense<0.000000e+00> : vector<16x512xf32>
    %72 = tpu.matmul %70, %71, %cst_40 {dimension_numbers = #tpu.dot_dimension_numbers<[1], [0], [0], [1], [0, 0, 1, 1], [], []>} : vector<16x256xbf16>, vector<256x512xbf16>, vector<16x512xf32> -> vector<16x512xf32>
    %c0_41 = arith.constant 0 : index
    %c0_42 = arith.constant 0 : index
    %73 = vector.load %arg15[%c0_41, %c0_42] : memref<1x512xf32, #tpu.memory_space<vmem>>, vector<1x512xf32>
    %74 = vector.broadcast %73 : vector<1x512xf32> to vector<16x512xf32>
    %75 = arith.addf %72, %74 : vector<16x512xf32>
    %cst_43 = arith.constant 0.000000e+00 : f32
    %76 = vector.broadcast %cst_43 : f32 to vector<16x512xf32>
    %77 = arith.maximumf %75, %76 : vector<16x512xf32>
    %78 = arith.truncf %77 : vector<16x512xf32> to vector<16x512xbf16>
    %c0_44 = arith.constant 0 : index
    %c0_45 = arith.constant 0 : index
    %79 = vector.load %arg16[%c0_44, %c0_45] : memref<512x128xbf16, #tpu.memory_space<vmem>>, vector<512x128xbf16>
    %cst_46 = arith.constant dense<0.000000e+00> : vector<16x128xf32>
    %80 = tpu.matmul %78, %79, %cst_46 {dimension_numbers = #tpu.dot_dimension_numbers<[1], [0], [0], [1], [0, 0, 1, 1], [], []>} : vector<16x512xbf16>, vector<512x128xbf16>, vector<16x128xf32> -> vector<16x128xf32>
    %c0_47 = arith.constant 0 : index
    %c0_48 = arith.constant 0 : index
    %81 = vector.load %arg17[%c0_47, %c0_48] : memref<1x128xf32, #tpu.memory_space<vmem>>, vector<1x128xf32>
    %82 = vector.broadcast %81 : vector<1x128xf32> to vector<16x128xf32>
    %83 = arith.addf %80, %82 : vector<16x128xf32>
    %84 = tpu.iota {dimensions = array<i32: 1>} : vector<8x128xi32>
    %c8_i32 = arith.constant 8 : i32
    %85 = vector.broadcast %c8_i32 : i32 to vector<8x128xi32>
    %86 = arith.cmpi slt, %84, %85 : vector<8x128xi32>
    %87 = vector.extract_strided_slice %83 {offsets = [0, 0], sizes = [8, 128], strides = [1, 1]} : vector<16x128xf32> to vector<8x128xf32>
    %88 = vector.extract_strided_slice %83 {offsets = [8, 0], sizes = [8, 128], strides = [1, 1]} : vector<16x128xf32> to vector<8x128xf32>
    %89 = arith.select %86, %87, %88 : vector<8x128xi1>, vector<8x128xf32>
    %90 = arith.addf %89, %49 : vector<8x128xf32>
    %c0_49 = arith.constant 0 : index
    %c0_50 = arith.constant 0 : index
    %91 = vector.load %arg18[%c0_49, %c0_50] : memref<8x128xf32, #tpu.memory_space<vmem>>, vector<8x128xf32>
    tpu.vector_store %arg18[%c0_49, %c0_50], %90 {strides = array<i32>} : memref<8x128xf32, #tpu.memory_space<vmem>>, vector<8x128xf32>,
    return
  }
  func.func @transform_0(%arg0: i32) -> (i32, i32) {
    %c0_i32 = arith.constant 0 : i32
    %c0_i32_0 = arith.constant 0 : i32
    return %arg0, %c0_i32 : i32, i32
  }
  func.func @transform_1(%arg0: i32) -> (i32, i32) {
    %c0_i32 = arith.constant 0 : i32
    %c0_i32_0 = arith.constant 0 : i32
    %c0_i32_1 = arith.constant 0 : i32
    return %c0_i32, %c0_i32_0 : i32, i32
  }
  func.func @transform_2(%arg0: i32) -> (i32, i32) {
    %c0_i32 = arith.constant 0 : i32
    %c0_i32_0 = arith.constant 0 : i32
    %c0_i32_1 = arith.constant 0 : i32
    return %c0_i32, %c0_i32_0 : i32, i32
  }
  func.func @transform_3(%arg0: i32) -> (i32, i32) {
    %c0_i32 = arith.constant 0 : i32
    %c0_i32_0 = arith.constant 0 : i32
    %c0_i32_1 = arith.constant 0 : i32
    return %c0_i32, %c0_i32_0 : i32, i32
  }
  func.func @transform_4(%arg0: i32) -> (i32, i32) {
    %c0_i32 = arith.constant 0 : i32
    %c0_i32_0 = arith.constant 0 : i32
    %c0_i32_1 = arith.constant 0 : i32
    return %c0_i32, %c0_i32_0 : i32, i32
  }
  func.func @transform_5(%arg0: i32) -> (i32, i32) {
    %c0_i32 = arith.constant 0 : i32
    %c0_i32_0 = arith.constant 0 : i32
    %c0_i32_1 = arith.constant 0 : i32
    return %c0_i32, %c0_i32_0 : i32, i32
  }
  func.func @transform_6(%arg0: i32) -> (i32, i32) {
    %c0_i32 = arith.constant 0 : i32
    %c0_i32_0 = arith.constant 0 : i32
    %c0_i32_1 = arith.constant 0 : i32
    return %c0_i32, %c0_i32_0 : i32, i32
  }
  func.func @transform_7(%arg0: i32) -> (i32, i32) {
    %c0_i32 = arith.constant 0 : i32
    %c0_i32_0 = arith.constant 0 : i32
    %c0_i32_1 = arith.constant 0 : i32
    return %c0_i32, %c0_i32_0 : i32, i32
  }
  func.func @transform_8(%arg0: i32) -> (i32, i32) {
    %c0_i32 = arith.constant 0 : i32
    %c0_i32_0 = arith.constant 0 : i32
    %c0_i32_1 = arith.constant 0 : i32
    return %c0_i32, %c0_i32_0 : i32, i32
  }
  func.func @transform_9(%arg0: i32) -> (i32, i32) {
    %c0_i32 = arith.constant 0 : i32
    %c0_i32_0 = arith.constant 0 : i32
    %c0_i32_1 = arith.constant 0 : i32
    return %c0_i32, %c0_i32_0 : i32, i32
  }
  func.func @transform_10(%arg0: i32) -> (i32, i32) {
    %c0_i32 = arith.constant 0 : i32
    %c0_i32_0 = arith.constant 0 : i32
    %c0_i32_1 = arith.constant 0 : i32
    return %c0_i32, %c0_i32_0 : i32, i32
  }
  func.func @transform_11(%arg0: i32) -> (i32, i32) {
    %c0_i32 = arith.constant 0 : i32
    %c0_i32_0 = arith.constant 0 : i32
    %c0_i32_1 = arith.constant 0 : i32
    return %c0_i32, %c0_i32_0 : i32, i32
  }
  func.func @transform_12(%arg0: i32) -> (i32, i32) {
    %c0_i32 = arith.constant 0 : i32
    %c0_i32_0 = arith.constant 0 : i32
    %c0_i32_1 = arith.constant 0 : i32
    return %c0_i32, %c0_i32_0 : i32, i32
  }
  func.func @transform_13(%arg0: i32) -> (i32, i32) {
    %c0_i32 = arith.constant 0 : i32
    %c0_i32_0 = arith.constant 0 : i32
    %c0_i32_1 = arith.constant 0 : i32
    return %c0_i32, %c0_i32_0 : i32, i32
  }
  func.func @transform_14(%arg0: i32) -> (i32, i32) {
    %c0_i32 = arith.constant 0 : i32
    %c0_i32_0 = arith.constant 0 : i32
    %c0_i32_1 = arith.constant 0 : i32
    return %c0_i32, %c0_i32_0 : i32, i32
  }
  func.func @transform_15(%arg0: i32) -> (i32, i32) {
    %c0_i32 = arith.constant 0 : i32
    %c0_i32_0 = arith.constant 0 : i32
    %c0_i32_1 = arith.constant 0 : i32
    return %c0_i32, %c0_i32_0 : i32, i32
  }
  func.func @transform_16(%arg0: i32) -> (i32, i32) {
    %c0_i32 = arith.constant 0 : i32
    %c0_i32_0 = arith.constant 0 : i32
    %c0_i32_1 = arith.constant 0 : i32
    return %c0_i32, %c0_i32_0 : i32, i32
  }
  func.func @transform_17(%arg0: i32) -> (i32, i32) {
    %c0_i32 = arith.constant 0 : i32
    %c0_i32_0 = arith.constant 0 : i32
    return %arg0, %c0_i32 : i32, i32
  }
}

</mosaic_0001>

<bundles_post_ra>
// kernel: tpu_custom_call.1
= control target key start
LH: loop header
LB: loop body
LE: loop exit
PB: predicated region body
PF: predicated region fallthrough
CT: control target
= control target key end

     0   :  { %s4858_s0 = inlined_call_operand.hbm [shape: f32[8,128], index: 0, kind: input, shape index: {}]   ;;  %s4859_s1 = inlined_call_operand.hbm [shape: bf16[24,1024], index: 1, kind: input, shape index: {}]   ;;  %s4860_s2 = inlined_call_operand.hbm [shape: f32[1,1024], index: 2, kind: input, shape index: {}]   ;;  %s4861_s3 = inlined_call_operand.hbm [shape: bf16[512,256], index: 3, kind: input, shape index: {}]   ;;  %s4862_s4 = inlined_call_operand.vmem [shape: f32[1,256], index: 4, kind: input, shape index: {}]   ;;  %s4863_s5 = inlined_call_operand.hbm [shape: bf16[256,512], index: 5, kind: input, shape index: {}]   ;;  %s4864_s6 = inlined_call_operand.vmem [shape: f32[1,512], index: 6, kind: input, shape index: {}]   ;;  %s4865_s7 = inlined_call_operand.hbm [shape: bf16[512,256], index: 7, kind: input, shape index: {}]   ;;  %s4866_s8 = inlined_call_operand.vmem [shape: f32[1,256], index: 8, kind: input, shape index: {}]   ;;  %s4867_s9 = inlined_call_operand.hbm [shape: bf16[256,128], index: 9, kind: input, shape index: {}]   ;;  %s4868_s10 = inlined_call_operand.hbm [shape: bf16[256,128], index: 10, kind: input, shape index: {}]   ;;  %s4869_s11 = inlined_call_operand.vmem [shape: f32[1,128], index: 11, kind: input, shape index: {}]   ;;  %s4870_s12 = inlined_call_operand.vmem [shape: bf16[8,256], index: 12, kind: input, shape index: {}]   ;;  %s4871_s13 = inlined_call_operand.hbm [shape: bf16[256,512], index: 13, kind: input, shape index: {}]   ;;  %s4872_s14 = inlined_call_operand.vmem [shape: f32[1,512], index: 14, kind: input, shape index: {}]   ;;  %s4873_s15 = inlined_call_operand.hbm [shape: bf16[512,128], index: 15, kind: input, shape index: {}]   ;;  %s4874_s16 = inlined_call_operand.vmem [shape: f32[1,128], index: 16, kind: input, shape index: {}]   ;;  %s4875_s17 = inlined_call_operand.hbm [shape: f32[8,128], index: 17, kind: output, shape index: {}]  }
   0x1   :  { %4879 = sst [smem:[#allocation27_spill]] %s4858_s0 }
   0x2   :  { %4880 = sst [smem:[#allocation28_spill]] %s4859_s1 }
   0x3   :  { %4881 = sst [smem:[#allocation29_spill]] %s4875_s17 }
   0x4   :  { %22 = vsyncpa [#allocation3], 0 }
   0x5   :  { %23 = vsyncpa [#allocation6], 0 }
   0x6   :  { %24 = vsyncpa [#allocation9], 0 }
   0x7   :  { %25 = vsyncpa [#allocation12], 0 }
   0x8   :  { %26 = vsyncpa [#allocation15], 0 }
   0x9   :  { %27 = vsyncpa [#allocation18], 0 }
   0xa   :  { %28 = vsyncpa [#allocation4], 0  ;;  %s4488_s24 = smov [#allocation5]   ;;  %s4882_s28 = sld [smem:[#allocation28_spill]] }
   0xb   :  { %s44_s25 = sshll.u32 %s4488_s24, 4  ;;  %s45_s25 = int_to_ptr.vmem [resolvable:$true] %s44_s25 }
  0x10   :  { %s4232_s29 = scalar_lea.hbm %s4882_s28, 1536 }
  0x11   :  { %p4233_p0 = scmp.ne.s32.totalorder %s4882_s28, %s4232_s29  ;;  %p4236_p1 = scmp.lt.u32.totalorder %s4232_s29, %s4882_s28 }
  0x13   :  { %p4238_p2 = pnand %p4236_p1, %p4233_p0 }
  0x15   :  { %4241 = shalt.err (!%p4238_p2)
}
  0x16   :  { %s4242_s1 = scalar_lea.vmem %s45_s25, 1536  ;;  %p4247_p4 = scmp.lt.s32.totalorder %s45_s25, %s45_s25 }
  0x17   :  { %p4243_p3 = scmp.ne.s32.totalorder %s45_s25, %s4242_s1  ;;  %p4248_p5 = scmp.lt.s32.totalorder %s4242_s1, %s4242_s1 }
  0x19   :  { %p4249_p6 = por %p4248_p5, %p4247_p4 }
  0x1b   :  { %p4250_p7 = pnand %p4249_p6, %p4243_p3 }
  0x1d   :  { %4253 = shalt.err (!%p4250_p7)
}
  0x1e   :  { %s4489_s20 = smov 512   ;;  %s4490_s21 = smov 32  }
  0x1f   :  { %50 = dma.hbm_to_vmem [thread:$0]  %s4882_s28, 1536, %s45_s25, [#allocation6], %s4489_s20, %s4489_s20, %s4490_s21  }
  0x20   :  { %s4491_s24 = smov [#allocation8]   ;;  %s4254_s0 = scalar_lea.hbm %s4861_s3, 8192 }
  0x21   :  { %s66_s26 = sshll.u32 %s4491_s24, 4  ;;  %p4255_p8 = scmp.ne.s32.totalorder %s4861_s3, %s4254_s0  ;;  %s67_s26 = int_to_ptr.vmem [resolvable:$true] %s66_s26 }
  0x22   :  { %p4258_p9 = scmp.lt.u32.totalorder %s4254_s0, %s4861_s3 }
  0x24   :  { %p4260_p10 = pnand %p4258_p9, %p4255_p8 }
  0x26   :  { %4263 = shalt.err (!%p4260_p10)
}
  0x27   :  { %s4264_s17 = scalar_lea.vmem %s67_s26, 8192  ;;  %p4269_p12 = scmp.lt.s32.totalorder %s67_s26, %s67_s26 }
  0x28   :  { %p4265_p11 = scmp.ne.s32.totalorder %s67_s26, %s4264_s17  ;;  %p4270_p13 = scmp.lt.s32.totalorder %s4264_s17, %s4264_s17 }
  0x2a   :  { %p4271_p0 = por %p4270_p13, %p4269_p12 }
  0x2c   :  { %p4272_p1 = pnand %p4271_p0, %p4265_p11 }
  0x2e   :  { %4275 = shalt.err (!%p4272_p1)
}
  0x2f   :  { %s4492_s25 = smov 128   ;;  %s4493_s28 = smov 8  }
  0x30   :  { %72 = dma.hbm_to_vmem [thread:$0]  %s4861_s3, 8192, %s67_s26, [#allocation9], %s4492_s25, %s4492_s25, %s4493_s28  }
  0x31   :  { %s4494_s22 = smov [#allocation11]   ;;  %s4276_s29 = scalar_lea.hbm %s4865_s7, 8192 }
  0x32   :  { %s94_s23 = sshll.u32 %s4494_s22, 4  ;;  %p4277_p2 = scmp.ne.s32.totalorder %s4865_s7, %s4276_s29  ;;  %s95_s23 = int_to_ptr.vmem [resolvable:$true] %s94_s23 }
  0x33   :  { %p4280_p3 = scmp.lt.u32.totalorder %s4276_s29, %s4865_s7 }
  0x35   :  { %p4282_p4 = pnand %p4280_p3, %p4277_p2 }
  0x37   :  { %4285 = shalt.err (!%p4282_p4)
}
  0x38   :  { %s4286_s19 = scalar_lea.vmem %s95_s23, 8192  ;;  %p4291_p6 = scmp.lt.s32.totalorder %s95_s23, %s95_s23 }
  0x39   :  { %p4287_p5 = scmp.ne.s32.totalorder %s95_s23, %s4286_s19  ;;  %p4292_p7 = scmp.lt.s32.totalorder %s4286_s19, %s4286_s19 }
  0x3b   :  { %p4293_p8 = por %p4292_p7, %p4291_p6 }
  0x3d   :  { %p4294_p9 = pnand %p4293_p8, %p4287_p5 }
  0x3f   :  { %4297 = shalt.err (!%p4294_p9)
}
  0x40   :  { %100 = dma.hbm_to_vmem [thread:$0]  %s4865_s7, 8192, %s95_s23, [#allocation12], %s4492_s25, %s4492_s25, %s4493_s28  }
  0x41   :  { %s4495_s1 = smov [#allocation14]   ;;  %s4496_s21 = smov [#allocation2]  }
  0x42   :  { %s120_s20 = sshll.u32 %s4495_s1, 4  ;;  %s35_s22 = sshll.u32 %s4496_s21, 4  ;;  %s121_s20 = int_to_ptr.vmem [resolvable:$true] %s120_s20  ;;  %s36_s22 = int_to_ptr.vmem [resolvable:$true] %s35_s22 }
  0x43   :  { %s4298_s29 = scalar_lea.hbm %s4868_s10, 2048 }
  0x44   :  { %p4299_p10 = scmp.ne.s32.totalorder %s4868_s10, %s4298_s29  ;;  %p4302_p11 = scmp.lt.u32.totalorder %s4298_s29, %s4868_s10 }
  0x46   :  { %p4304_p12 = pnand %p4302_p11, %p4299_p10 }
  0x48   :  { %4307 = shalt.err (!%p4304_p12)
}
  0x49   :  { %s4308_s7 = scalar_lea.vmem %s121_s20, 2048  ;;  %p4313_p0 = scmp.lt.s32.totalorder %s121_s20, %s121_s20 }
  0x4a   :  { %p4309_p13 = scmp.ne.s32.totalorder %s121_s20, %s4308_s7  ;;  %p4314_p1 = scmp.lt.s32.totalorder %s4308_s7, %s4308_s7 }
  0x4c   :  { %p4315_p2 = por %p4314_p1, %p4313_p0 }
  0x4e   :  { %p4316_p3 = pnand %p4315_p2, %p4309_p13 }
  0x50   :  { %4319 = shalt.err (!%p4316_p3)
}
  0x51   :  { %s4497_s25 = smov 64   ;;  %s4498_s28 = smov 4  }
  0x52   :  { %126 = dma.hbm_to_vmem [thread:$0]  %s4868_s10, 2048, %s121_s20, [#allocation15], %s4497_s25, %s4497_s25, %s4498_s28  }
  0x53   :  { %s4883_s1 = sld [smem:[#allocation27_spill]] }
  0x59   :  { %s4320_s21 = scalar_lea.hbm %s4883_s1, 128 }
  0x5a   :  { %p4321_p4 = scmp.ne.s32.totalorder %s4883_s1, %s4320_s21  ;;  %p4324_p5 = scmp.lt.u32.totalorder %s4320_s21, %s4883_s1 }
  0x5c   :  { %p4326_p6 = pnand %p4324_p5, %p4321_p4 }
  0x5e   :  { %4329 = shalt.err (!%p4326_p6)
}
  0x5f   :  { %s4330_s30 = scalar_lea.vmem %s36_s22, 128  ;;  %p4335_p8 = scmp.lt.s32.totalorder %s36_s22, %s36_s22 }
  0x60   :  { %p4331_p7 = scmp.ne.s32.totalorder %s36_s22, %s4330_s30  ;;  %p4336_p9 = scmp.lt.s32.totalorder %s4330_s30, %s4330_s30 }
  0x62   :  { %p4337_p10 = por %p4336_p9, %p4335_p8 }
  0x64   :  { %p4338_p11 = pnand %p4337_p10, %p4331_p7 }
  0x66   :  { %4341 = shalt.err (!%p4338_p11)
}
  0x67   :  { %38 = dma.hbm_to_vmem [thread:$0]  %s4883_s1, 128, %s36_s22, [#allocation3]  }
  0x68   :  { %s4499_s17 = smov [#allocation7]   ;;  %s4500_s7 = smov [#allocation10]  }
  0x69   :  { %s57_s18 = sshll.u32 %s4499_s17, 4  ;;  %s80_s23 = sshll.u32 %s4500_s7, 4  ;;  %s58_s18 = int_to_ptr.vmem [resolvable:$true] %s57_s18  ;;  %s81_s23 = int_to_ptr.vmem [resolvable:$true] %s80_s23 }
  0x6a   :  { %s4342_s26 = scalar_lea.hbm %s4860_s2, 128 }
  0x6b   :  { %p4343_p12 = scmp.ne.s32.totalorder %s4860_s2, %s4342_s26  ;;  %p4346_p13 = scmp.lt.u32.totalorder %s4342_s26, %s4860_s2 }
  0x6d   :  { %p4348_p0 = pnand %p4346_p13, %p4343_p12 }
  0x6f   :  { %4351 = shalt.err (!%p4348_p0)
}
  0x70   :  { %s4352_s22 = scalar_lea.vmem %s58_s18, 128  ;;  %p4357_p2 = scmp.lt.s32.totalorder %s58_s18, %s58_s18 }
  0x71   :  { %p4353_p1 = scmp.ne.s32.totalorder %s58_s18, %s4352_s22  ;;  %p4358_p3 = scmp.lt.s32.totalorder %s4352_s22, %s4352_s22 }
  0x73   :  { %p4359_p4 = por %p4358_p3, %p4357_p2 }
  0x75   :  { %p4360_p5 = pnand %p4359_p4, %p4353_p1 }
  0x77   :  { %4363 = shalt.err (!%p4360_p5)
}
  0x78   :  { %60 = dma.hbm_to_vmem [thread:$0]  %s4860_s2, 128, %s58_s18, [#allocation6]  }
  0x79   :  { %s4364_s20 = scalar_lea.hbm %s4863_s5, 8192 }
  0x7a   :  { %p4365_p6 = scmp.ne.s32.totalorder %s4863_s5, %s4364_s20  ;;  %p4368_p7 = scmp.lt.u32.totalorder %s4364_s20, %s4863_s5 }
  0x7c   :  { %p4370_p8 = pnand %p4368_p7, %p4365_p6 }
  0x7e   :  { %4373 = shalt.err (!%p4370_p8)
}
  0x7f   :  { %s4374_s26 = scalar_lea.vmem %s81_s23, 8192  ;;  %p4379_p10 = scmp.lt.s32.totalorder %s81_s23, %s81_s23 }
  0x80   :  { %p4375_p9 = scmp.ne.s32.totalorder %s81_s23, %s4374_s26  ;;  %p4380_p11 = scmp.lt.s32.totalorder %s4374_s26, %s4374_s26 }
  0x82   :  { %p4381_p12 = por %p4380_p11, %p4379_p10 }
  0x84   :  { %p4382_p13 = pnand %p4381_p12, %p4375_p9 }
  0x86   :  { %4385 = shalt.err (!%p4382_p13)
}
  0x87   :  { %s4501_s2 = smov 256   ;;  %s4502_s18 = smov 16  }
  0x88   :  { %86 = dma.hbm_to_vmem [thread:$0]  %s4863_s5, 8192, %s81_s23, [#allocation9], %s4501_s2, %s4501_s2, %s4502_s18  }
  0x89   :  { %s4503_s27 = smov [#allocation13]   ;;  %s4504_s22 = smov [#allocation16]  }
  0x8a   :  { %s108_s29 = sshll.u32 %s4503_s27, 4  ;;  %s136_s1 = sshll.u32 %s4504_s22, 4  ;;  %s109_s29 = int_to_ptr.vmem [resolvable:$true] %s108_s29  ;;  %s137_s1 = int_to_ptr.vmem [resolvable:$true] %s136_s1 }
  0x8b   :  { %s4386_s10 = scalar_lea.hbm %s4867_s9, 2048 }
  0x8c   :  { %p4387_p0 = scmp.ne.s32.totalorder %s4867_s9, %s4386_s10  ;;  %p4390_p1 = scmp.lt.u32.totalorder %s4386_s10, %s4867_s9 }
  0x8e   :  { %p4392_p2 = pnand %p4390_p1, %p4387_p0 }
  0x90   :  { %4395 = shalt.err (!%p4392_p2)
}
  0x91   :  { %s4396_s5 = scalar_lea.vmem %s109_s29, 2048  ;;  %p4401_p4 = scmp.lt.s32.totalorder %s109_s29, %s109_s29 }
  0x92   :  { %p4397_p3 = scmp.ne.s32.totalorder %s109_s29, %s4396_s5  ;;  %p4402_p5 = scmp.lt.s32.totalorder %s4396_s5, %s4396_s5 }
  0x94   :  { %p4403_p6 = por %p4402_p5, %p4401_p4 }
  0x96   :  { %p4404_p7 = pnand %p4403_p6, %p4397_p3 }
  0x98   :  { %4407 = shalt.err (!%p4404_p7)
}
  0x99   :  { %114 = dma.hbm_to_vmem [thread:$0]  %s4867_s9, 2048, %s109_s29, [#allocation12], %s4497_s25, %s4497_s25, %s4498_s28  }
  0x9a   :  { %s4408_s24 = scalar_lea.hbm %s4871_s13, 8192 }
  0x9b   :  { %p4409_p8 = scmp.ne.s32.totalorder %s4871_s13, %s4408_s24  ;;  %p4412_p9 = scmp.lt.u32.totalorder %s4408_s24, %s4871_s13 }
  0x9d   :  { %p4414_p10 = pnand %p4412_p9, %p4409_p8 }
  0x9f   :  { %4417 = shalt.err (!%p4414_p10)
}
  0xa0   :  { %s4418_s10 = scalar_lea.vmem %s137_s1, 8192  ;;  %p4423_p12 = scmp.lt.s32.totalorder %s137_s1, %s137_s1 }
  0xa1   :  { %p4419_p11 = scmp.ne.s32.totalorder %s137_s1, %s4418_s10  ;;  %p4424_p13 = scmp.lt.s32.totalorder %s4418_s10, %s4418_s10 }
  0xa3   :  { %p4425_p0 = por %p4424_p13, %p4423_p12 }
  0xa5   :  { %p4426_p1 = pnand %p4425_p0, %p4419_p11 }
  0xa7   :  { %4429 = shalt.err (!%p4426_p1)
}
  0xa8   :  { %142 = dma.hbm_to_vmem [thread:$0]  %s4871_s13, 8192, %s137_s1, [#allocation15], %s4501_s2, %s4501_s2, %s4502_s18  }
  0xa9   :  { %s4505_s20 = smov [#allocation17]   ;;  %s4430_s5 = scalar_lea.hbm %s4873_s15, 4096 }
  0xaa   :  { %s150_s17 = sshll.u32 %s4505_s20, 4  ;;  %p4431_p2 = scmp.ne.s32.totalorder %s4873_s15, %s4430_s5  ;;  %s151_s17 = int_to_ptr.vmem [resolvable:$true] %s150_s17 }
  0xab   :  { %p4434_p3 = scmp.lt.u32.totalorder %s4430_s5, %s4873_s15 }
  0xad   :  { %p4436_p4 = pnand %p4434_p3, %p4431_p2 }
  0xaf   :  { %4439 = shalt.err (!%p4436_p4)
}
  0xb0   :  { %s4440_s24 = scalar_lea.vmem %s151_s17, 4096  ;;  %p4445_p6 = scmp.lt.s32.totalorder %s151_s17, %s151_s17 }
  0xb1   :  { %p4441_p5 = scmp.ne.s32.totalorder %s151_s17, %s4440_s24  ;;  %p4446_p7 = scmp.lt.s32.totalorder %s4440_s24, %s4440_s24 }
  0xb3   :  { %p4447_p8 = por %p4446_p7, %p4445_p6 }
  0xb5   :  { %p4448_p9 = pnand %p4447_p8, %p4441_p5 }
  0xb7   :  { %4451 = shalt.err (!%p4448_p9)
}
  0xb8   :  { %156 = dma.hbm_to_vmem [thread:$0]  %s4873_s15, 4096, %s151_s17, [#allocation18], %s4497_s25, %s4497_s25, %s4498_s28  }
  0xb9   :  { %4474 = dma.done.wait [#allocation3], 128  }
  0xba   :  { %4475 = vsyncadd [#allocation3], 4294967168 }
  0xbb   :  { %4476 = dma.done.wait [#allocation6], 1664  }
  0xbc   :  { %4477 = vsyncadd [#allocation6], 4294965632 }
  0xbd   :  { %4478 = dma.done.wait [#allocation9], 16384  }
  0xbe   :  { %4479 = vsyncadd [#allocation9], 4294950912 }
  0xbf   :  { %4480 = dma.done.wait [#allocation12], 10240  }
  0xc0   :  { %4481 = vsyncadd [#allocation12], 4294957056 }
  0xc1   :  { %4482 = dma.done.wait [#allocation15], 10240  }
  0xc2   :  { %4483 = vsyncadd [#allocation15], 4294957056 }
  0xc3   :  { %4484 = dma.done.wait [#allocation18], 4096  }
  0xc4   :  { %4485 = vsyncadd [#allocation18], 4294963200  ;;  %v4506_v0 = vmov 0   ;;  %v192_v1 = vld [vmem:[#allocation5] sm:$0xff]  ;;  %v194_v8 = vld [vmem:[#allocation5 + $0x10] sm:$0xff]  ;;  %vm310_vm0 = vcmask 1043456  }
  0xc5   :  { %367 = vmatprep.mubr.bf16.mxu0 %v4506_v0  ;;  %408 = vmatprep.mubr.bf16.mxu1 %v4506_v0  ;;  %v196_v2 = vld [vmem:[#allocation5 + $0x20] sm:$0xff]  ;;  %v198_v9 = vld [vmem:[#allocation5 + $0x30] sm:$0xff]  ;;  %v193_v10 = vld [vmem:[#allocation5 + $0x8] sm:$0xff]  ;;  %vm306_vm1 = vcmask 195584   ;;  %s4507_s27 = smov 120   ;;  %vm2342_vm2 = vcmask 64512  }
  0xc6   :  { %v200_v3 = vld [vmem:[#allocation5 + $0x40] sm:$0xff]  ;;  %v3295_v4 = vcombine.high %v192_v1, %v196_v2  ;;  %v3294_v5 = vcombine.low %v192_v1, %v196_v2  ;;  %v197_v11 = vld [vmem:[#allocation5 + $0x28] sm:$0xff]  ;;  %v190_v12 = vld [vmem:[#allocation2] sm:$0xff]  ;;  %v3299_v21 = vcombine.high %v194_v8, %v198_v9  ;;  %v3298_v26 = vcombine.low %v194_v8, %v198_v9  ;;  %s4509_s9 = smov [#allocation19]  }
  0xc7   :  { %v3303_v6 = vcombine.high %v200_v3, %v200_v3  ;;  %v3302_v7 = vcombine.low %v200_v3, %v200_v3  ;;  %v3297_v13 = vcombine.high %v193_v10, %v197_v11  ;;  %v201_v14 = vld [vmem:[#allocation5 + $0x48] sm:$0xff]  ;;  %v195_v15 = vld [vmem:[#allocation5 + $0x18] sm:$0xff]  ;;  %v3296_v16 = vcombine.low %v193_v10, %v197_v11  ;;  %v202_v22 = vld [vmem:[#allocation5 + $0x50] sm:$0xff]  ;;  %s3280_s29 = sshll.u32 %s4509_s9, 4  ;;  %s3281_s29 = int_to_ptr.vmem [resolvable:$true] %s3280_s29 }
  0xc8   :  { %335 = vmatprep.subr.bf16.mxu0 %v3295_v4  ;;  %v3305_v17 = vcombine.high %v201_v14, %v201_v14  ;;  %v3304_v18 = vcombine.low %v201_v14, %v201_v14  ;;  %v199_v19 = vld [vmem:[#allocation5 + $0x38] sm:$0xff]  ;;  %v191_v23 = vpack.c.bf16 %v190_v12, %v190_v12  ;;  %v3307_v28 = vcombine.high %v202_v22, %v202_v22  ;;  %v3778_v34 = vld [vmem:[#allocation8 + $0x4] ss:$8 sps:$4 sm:$0xff]   ;;  %v3776_v37 = vld [vmem:[#allocation8] ss:$8 sps:$4 sm:$0xff]   ;;  %p4457_p11 = scmp.lt.s32.totalorder %s3281_s29, %s3281_s29 }
  0xc9   :  { %336 = vmatpush1.bf16.msra.mxu0 %v3294_v5  ;;  %v312_v20 = vsel %vm310_vm0, %v3302_v7, 0  ;;  %376 = vmatprep.subr.bf16.mxu1 %v3297_v13  ;;  %v3301_v25 = vcombine.high %v195_v15, %v199_v19  ;;  %v203_v27 = vld [vmem:[#allocation5 + $0x58] sm:$0xff]  ;;  %v3306_v29 = vcombine.low %v202_v22, %v202_v22  ;;  %v3300_v30 = vcombine.low %v195_v15, %v199_v19  ;;  %v3786_v42 = vld [vmem:[#allocation8 + $0x24] ss:$8 sps:$4 sm:$0xff]   ;;  %v3784_v45 = vld [vmem:[#allocation8 + $0x20] ss:$8 sps:$4 sm:$0xff]  }
  0xca   :  { %3310 = vmatprep.subr.msk.bf16.mxu0 %vm310_vm0, %v3303_v6  ;;  %377 = vmatpush1.bf16.msra.mxu1 %v3296_v16  ;;  %v318_v24 = vsel %vm310_vm0, %v3304_v18, 0  ;;  %v3309_v31 = vcombine.high %v203_v27, %v203_v27  ;;  %v3308_v32 = vcombine.low %v203_v27, %v203_v27  ;;  %v3789_v36 = vld [vmem:[#allocation10 + $0x4] ss:$16 sps:$4 sm:$0xff]   ;;  %v3787_v39 = vld [vmem:[#allocation10] ss:$16 sps:$4 sm:$0xff]  }
  0xcb   :  { %3312 = vmatprep.subr.msk.bf16.mxu1 %vm310_vm0, %v3305_v17  ;;  %v324_v33 = vsel %vm310_vm0, %v3306_v29, 0  ;;  %v3783_v38 = vld [vmem:[#allocation8 + $0x14] ss:$8 sps:$4 sm:$0xff]   ;;  %v3781_v41 = vld [vmem:[#allocation8 + $0x10] ss:$8 sps:$4 sm:$0xff]  }
  0xcc   :  { %v330_v35 = vsel %vm310_vm0, %v3308_v32, 0  ;;  %v3795_v40 = vld [vmem:[#allocation10 + $0x24] ss:$16 sps:$4 sm:$0xff]   ;;  %v3793_v43 = vld [vmem:[#allocation10 + $0x20] ss:$16 sps:$4 sm:$0xff]  }
  0xcd   :  { %338 = vmatpush1.bf16.msra.mxu0 %v312_v20  ;;  %v3801_v44 = vld [vmem:[#allocation10 + $0x44] ss:$16 sps:$4 sm:$0xff]   ;;  %v3799_v47 = vld [vmem:[#allocation10 + $0x40] ss:$16 sps:$4 sm:$0xff]  }
  0xce   :  { %417 = vmatprep.subr.bf16.mxu0 %v3299_v21  ;;  %379 = vmatpush1.bf16.msra.mxu1 %v318_v24  ;;  %v3792_v46 = vld [vmem:[#allocation8 + $0x34] ss:$8 sps:$4 sm:$0xff]   ;;  %v3790_v49 = vld [vmem:[#allocation8 + $0x30] ss:$8 sps:$4 sm:$0xff]   ;;  %v3798_v50 = vld [vmem:[#allocation8 + $0x44] ss:$8 sps:$4 sm:$0xff]  }
  0xcf   :  { %458 = vmatprep.subr.bf16.mxu1 %v3301_v25  ;;  %v3807_v48 = vld [vmem:[#allocation10 + $0x64] ss:$16 sps:$4 sm:$0xff]   ;;  %v3805_v51 = vld [vmem:[#allocation10 + $0x60] ss:$16 sps:$4 sm:$0xff]  }
  0xd0   :  { %3311 = vmatmul.mubr.msk.bf16.vlgmr.msra.gmra.mrb[0].mxu0 %vm306_vm1, %v191_v23  ;;  %v3813_v52 = vld [vmem:[#allocation10 + $0x84] ss:$16 sps:$4 sm:$0xff]   ;;  %v3796_v53 = vld [vmem:[#allocation8 + $0x40] ss:$8 sps:$4 sm:$0xff]   ;;  %v3802_v57 = vld [vmem:[#allocation8 + $0x50] ss:$8 sps:$4 sm:$0xff]  }
  0xd1   :  { %418 = vmatpush1.bf16.msra.mxu0 %v3298_v26  ;;  %449 = vmatprep.mubr.bf16.mxu0 %v4506_v0  ;;  %v3804_v54 = vld [vmem:[#allocation8 + $0x54] ss:$8 sps:$4 sm:$0xff]   ;;  %v3811_v55 = vld [vmem:[#allocation10 + $0x80] ss:$16 sps:$4 sm:$0xff]   ;;  %v3810_v58 = vld [vmem:[#allocation8 + $0x64] ss:$8 sps:$4 sm:$0xff]  }
  0xd2   :  { %3314 = vmatprep.subr.msk.bf16.mxu0 %vm310_vm0, %v3307_v28  ;;  %3313 = vmatmul.mubr.msk.bf16.vlgmr.msra.gmra.mrb[0].mxu1 %vm306_vm1, %v191_v23  ;;  %v3819_v56 = vld [vmem:[#allocation10 + $0xa4] ss:$16 sps:$4 sm:$0xff]   ;;  %v3808_v59 = vld [vmem:[#allocation8 + $0x60] ss:$8 sps:$4 sm:$0xff]   ;;  %v3814_v2 = vld [vmem:[#allocation8 + $0x70] ss:$8 sps:$4 sm:$0xff]  }
  0xd3   :  { %459 = vmatpush1.bf16.msra.mxu1 %v3300_v30  ;;  %490 = vmatprep.mubr.bf16.mxu1 %v4506_v0  ;;  %v3817_v60 = vld [vmem:[#allocation10 + $0xa0] ss:$16 sps:$4 sm:$0xff]   ;;  %v3816_v61 = vld [vmem:[#allocation8 + $0x74] ss:$8 sps:$4 sm:$0xff]   ;;  %v3822_v3 = vld [vmem:[#allocation8 + $0x84] ss:$8 sps:$4 sm:$0xff]  }
  0xd4   :  { %3316 = vmatprep.subr.msk.bf16.mxu1 %vm310_vm0, %v3309_v31  ;;  %v3825_v62 = vld [vmem:[#allocation10 + $0xc4] ss:$16 sps:$4 sm:$0xff]   ;;  %v3823_v63 = vld [vmem:[#allocation10 + $0xc0] ss:$16 sps:$4 sm:$0xff]  }
  0xd5   :  { %420 = vmatpush1.bf16.msra.mxu0 %v324_v33  ;;  %v3831_v1 = vld [vmem:[#allocation10 + $0xe4] ss:$16 sps:$4 sm:$0xff]   ;;  %v3829_v4 = vld [vmem:[#allocation10 + $0xe0] ss:$16 sps:$4 sm:$0xff]  }
  0xd6   :  { %907 = vmatprep.subr.bf16.mxu0 %v3778_v34  ;;  %v3837_v5 = vld [vmem:[#allocation10 + $0x104] ss:$16 sps:$4 sm:$0xff]   ;;  %v3820_v6 = vld [vmem:[#allocation8 + $0x80] ss:$8 sps:$4 sm:$0xff]   ;;  %v3826_v10 = vld [vmem:[#allocation8 + $0x90] ss:$8 sps:$4 sm:$0xff]  }
  0xd7   :  { %461 = vmatpush1.bf16.msra.mxu1 %v330_v35  ;;  %v3828_v7 = vld [vmem:[#allocation8 + $0x94] ss:$8 sps:$4 sm:$0xff]   ;;  %v3835_v8 = vld [vmem:[#allocation10 + $0x100] ss:$16 sps:$4 sm:$0xff]   ;;  %v3834_v11 = vld [vmem:[#allocation8 + $0xa4] ss:$8 sps:$4 sm:$0xff]  }
  0xd8   :  { %3315 = vmatmul.mubr.msk.bf16.vlgmr.msra.gmra.mrb[4].mxu0 %vm306_vm1, %v191_v23  ;;  %1399 = vmatprep.subr.bf16.mxu1 %v3789_v36  ;;  %v3843_v9 = vld [vmem:[#allocation10 + $0x124] ss:$16 sps:$4 sm:$0xff]   ;;  %v3841_v12 = vld [vmem:[#allocation10 + $0x120] ss:$16 sps:$4 sm:$0xff]  }
  0xd9   :  { %908 = vmatpush1.bf16.msra.mxu0 %v3776_v37  ;;  %v3849_v13 = vld [vmem:[#allocation10 + $0x144] ss:$16 sps:$4 sm:$0xff]   ;;  %v3832_v14 = vld [vmem:[#allocation8 + $0xa0] ss:$8 sps:$4 sm:$0xff]   ;;  %v3838_v18 = vld [vmem:[#allocation8 + $0xb0] ss:$8 sps:$4 sm:$0xff]  }
  0xda   :  { %909 = vmatprep.subr.bf16.mxu0 %v3783_v38  ;;  %3317 = vmatmul.mubr.msk.bf16.vlgmr.msra.gmra.mrb[4].mxu1 %vm306_vm1, %v191_v23  ;;  %v3840_v15 = vld [vmem:[#allocation8 + $0xb4] ss:$8 sps:$4 sm:$0xff]   ;;  %v3847_v16 = vld [vmem:[#allocation10 + $0x140] ss:$16 sps:$4 sm:$0xff]   ;;  %v3846_v19 = vld [vmem:[#allocation8 + $0xc4] ss:$8 sps:$4 sm:$0xff]   ;;  %v206_v38 = vlaneseq }
  0xdb   :  { %1400 = vmatpush1.bf16.msra.mxu1 %v3787_v39  ;;  %v3855_v17 = vld [vmem:[#allocation10 + $0x164] ss:$16 sps:$4 sm:$0xff]   ;;  %v3853_v20 = vld [vmem:[#allocation10 + $0x160] ss:$16 sps:$4 sm:$0xff]   ;;  %v3885_v37 = vld [vmem:[#allocation10 + $0xc] ss:$16 sps:$4 sm:$0xff]  }
  0xdc   :  { %1401 = vmatprep.subr.bf16.mxu1 %v3795_v40  ;;  %v3844_v21 = vld [vmem:[#allocation8 + $0xc0] ss:$8 sps:$4 sm:$0xff]   ;;  %v3852_v22 = vld [vmem:[#allocation8 + $0xd4] ss:$8 sps:$4 sm:$0xff]   ;;  %v3850_v23 = vld [vmem:[#allocation8 + $0xd0] ss:$8 sps:$4 sm:$0xff]  }
  0xdd   :  { %910 = vmatpush1.bf16.msra.mxu0 %v3781_v41  ;;  %v3858_v24 = vld [vmem:[#allocation8 + $0xe4] ss:$8 sps:$4 sm:$0xff]   ;;  %v3856_v26 = vld [vmem:[#allocation8 + $0xe0] ss:$8 sps:$4 sm:$0xff]   ;;  %v3864_v28 = vld [vmem:[#allocation8 + $0xf4] ss:$8 sps:$4 sm:$0xff]  }
  0xde   :  { %911 = vmatprep.subr.bf16.mxu0 %v3786_v42  ;;  %v3861_v25 = vld [vmem:[#allocation10 + $0x184] ss:$16 sps:$4 sm:$0xff]   ;;  %v3859_v27 = vld [vmem:[#allocation10 + $0x180] ss:$16 sps:$4 sm:$0xff]   ;;  %v4752_v39 = vshrl.u32 %v206_v38, 7  ;;  %v4757_v41 = vld [vmem:[#allocation7] sm:$0xff] }
  0xdf   :  { %1402 = vmatpush1.bf16.msra.mxu1 %v3793_v43  ;;  %v3867_v29 = vld [vmem:[#allocation10 + $0x1a4] ss:$16 sps:$4 sm:$0xff]   ;;  %v3862_v30 = vld [vmem:[#allocation8 + $0xf0] ss:$8 sps:$4 sm:$0xff]  }
  0xe0   :  { %1403 = vmatprep.subr.bf16.mxu1 %v3801_v44  ;;  %v3865_v31 = vld [vmem:[#allocation10 + $0x1a0] ss:$16 sps:$4 sm:$0xff]   ;;  %v3870_v32 = vld [vmem:[#allocation8 + $0x104] ss:$8 sps:$4 sm:$0xff]   ;;  %v4755_v40 = vsub.s32 0, %v4752_v39  ;;  %v4760_v42 = vsub.s32 1, %v4752_v39 }
  0xe1   :  { %912 = vmatpush1.bf16.msra.mxu0 %v3784_v45  ;;  %v3873_v33 = vld [vmem:[#allocation10 + $0x1c4] ss:$16 sps:$4 sm:$0xff]   ;;  %v3871_v34 = vld [vmem:[#allocation10 + $0x1c0] ss:$16 sps:$4 sm:$0xff]   ;;  %v4763_v43 = vsub.s32 3, %v4752_v39 }
  0xe2   :  { %913 = vmatprep.subr.bf16.mxu0 %v3792_v46  ;;  %v3879_v35 = vld [vmem:[#allocation10 + $0x1e4] ss:$16 sps:$4 sm:$0xff]   ;;  %v3877_v36 = vld [vmem:[#allocation10 + $0x1e0] ss:$16 sps:$4 sm:$0xff]   ;;  %v209_v44 = vrot.slane %v4757_v41, %v4755_v40  ;;  %v213_v45 = vrot.slane %v4757_v41, %v4760_v42 }
  0xe3   :  { %1404 = vmatpush1.bf16.msra.mxu1 %v3799_v47  ;;  %v221_v47 = vrot.slane %v4757_v41, %v4763_v43 }
  0xe4   :  { %1405 = vmatprep.subr.bf16.mxu1 %v3807_v48 }
  0xe5   :  { %914 = vmatpush1.bf16.msra.mxu0 %v3790_v49 }
  0xe6   :  { %915 = vmatprep.subr.bf16.mxu0 %v3798_v50  ;;  %v224_v50 = vsub.s32 4, %v4752_v39 }
  0xe7   :  { %1406 = vmatpush1.bf16.msra.mxu1 %v3805_v51 }
  0xe8   :  { %1407 = vmatprep.subr.bf16.mxu1 %v3813_v52 }
  0xe9   :  { %916 = vmatpush1.bf16.msra.mxu0 %v3796_v53  ;;  %v228_v53 = vsub.s32 5, %v4752_v39 }
  0xea   :  { %917 = vmatprep.subr.bf16.mxu0 %v3804_v54 }
  0xeb   :  { %1408 = vmatpush1.bf16.msra.mxu1 %v3811_v55 }
  0xec   :  { %1409 = vmatprep.subr.bf16.mxu1 %v3819_v56 }
  0xed   :  { %918 = vmatpush1.bf16.msra.mxu0 %v3802_v57 }
  0xee   :  { %919 = vmatprep.subr.bf16.mxu0 %v3810_v58 }
  0xef   :  { %1410 = vmatpush1.bf16.msra.mxu1 %v3817_v60 }
  0xf0   :  { %1411 = vmatprep.subr.bf16.mxu1 %v3825_v62 }
  0xf1   :  { %920 = vmatpush1.bf16.msra.mxu0 %v3808_v59 }
  0xf2   :  { %921 = vmatprep.subr.bf16.mxu0 %v3816_v61  ;;  %v225_v61 = vrot.slane %v4757_v41, %v224_v50  ;;  %v3913_v50 = vld [vmem:[#allocation10 + $0xa8] ss:$16 sps:$4 sm:$0xff]  }
  0xf3   :  { %1412 = vmatpush1.bf16.msra.mxu1 %v3823_v63 }
  0xf4   :  { %1413 = vmatprep.subr.bf16.mxu1 %v3831_v1  ;;  %v3868_v1 = vld [vmem:[#allocation8 + $0x100] ss:$8 sps:$4 sm:$0xff]  }
  0xf5   :  { %922 = vmatpush1.bf16.msra.mxu0 %v3814_v2  ;;  %v229_v2 = vrot.slane %v4757_v41, %v228_v53  ;;  %v3916_v53 = vld [vmem:[#allocation8 + $0x180] ss:$8 sps:$4 sm:$0xff]  }
  0xf6   :  { %923 = vmatprep.subr.bf16.mxu0 %v3822_v3 }
  0xf7   :  { %1414 = vmatpush1.bf16.msra.mxu1 %v3829_v4 }
  0xf8   :  { %1415 = vmatprep.subr.bf16.mxu1 %v3837_v5  ;;  %v3876_v5 = vld [vmem:[#allocation8 + $0x114] ss:$8 sps:$4 sm:$0xff]  }
  0xf9   :  { %924 = vmatpush1.bf16.msra.mxu0 %v3820_v6 }
  0xfa   :  { %925 = vmatprep.subr.bf16.mxu0 %v3828_v7 }
  0xfb   :  { %1416 = vmatpush1.bf16.msra.mxu1 %v3835_v8 }
  0xfc   :  { %1417 = vmatprep.subr.bf16.mxu1 %v3843_v9 }
  0xfd   :  { %926 = vmatpush1.bf16.msra.mxu0 %v3826_v10 }
  0xfe   :  { %927 = vmatprep.subr.bf16.mxu0 %v3834_v11 }
  0xff   :  { %1418 = vmatpush1.bf16.msra.mxu1 %v3841_v12  ;;  %v3874_v12 = vld [vmem:[#allocation8 + $0x110] ss:$8 sps:$4 sm:$0xff]  }
 0x100   :  { %1419 = vmatprep.subr.bf16.mxu1 %v3849_v13 }
 0x101   :  { %928 = vmatpush1.bf16.msra.mxu0 %v3832_v14 }
 0x102   :  { %929 = vmatprep.subr.bf16.mxu0 %v3840_v15 }
 0x103   :  { %1420 = vmatpush1.bf16.msra.mxu1 %v3847_v16  ;;  %v3882_v16 = vld [vmem:[#allocation8 + $0x124] ss:$8 sps:$4 sm:$0xff]  }
 0x104   :  { %1421 = vmatprep.subr.bf16.mxu1 %v3855_v17 }
 0x105   :  { %930 = vmatpush1.bf16.msra.mxu0 %v3838_v18 }
 0x106   :  { %931 = vmatprep.subr.bf16.mxu0 %v3846_v19 }
 0x107   :  { %1422 = vmatpush1.bf16.msra.mxu1 %v3853_v20 }
 0x108   :  { %1423 = vmatprep.subr.bf16.mxu1 %v3861_v25  ;;  %v3888_v25 = vld [vmem:[#allocation8 + $0x134] ss:$8 sps:$4 sm:$0xff]  }
 0x109   :  { %932 = vmatpush1.bf16.msra.mxu0 %v3844_v21 }
 0x10a   :  { %933 = vmatprep.subr.bf16.mxu0 %v3852_v22  ;;  %v3880_v22 = vld [vmem:[#allocation8 + $0x120] ss:$8 sps:$4 sm:$0xff]  }
 0x10b   :  { %1424 = vmatpush1.bf16.msra.mxu1 %v3859_v27  ;;  %v3886_v27 = vld [vmem:[#allocation8 + $0x130] ss:$8 sps:$4 sm:$0xff]  }
 0x10c   :  { %1425 = vmatprep.subr.bf16.mxu1 %v3867_v29  ;;  %v3894_v29 = vld [vmem:[#allocation8 + $0x144] ss:$8 sps:$4 sm:$0xff]  }
 0x10d   :  { %934 = vmatpush1.bf16.msra.mxu0 %v3850_v23  ;;  %v3883_v23 = vld [vmem:[#allocation10 + $0x8] ss:$16 sps:$4 sm:$0xff]  }
 0x10e   :  { %935 = vmatprep.subr.bf16.mxu0 %v3858_v24 }
 0x10f   :  { %1426 = vmatpush1.bf16.msra.mxu1 %v3865_v31  ;;  %v3892_v31 = vld [vmem:[#allocation8 + $0x140] ss:$8 sps:$4 sm:$0xff]  }
 0x110   :  { %1427 = vmatprep.subr.bf16.mxu1 %v3873_v33  ;;  %v3900_v33 = vld [vmem:[#allocation8 + $0x154] ss:$8 sps:$4 sm:$0xff]  }
 0x111   :  { %936 = vmatpush1.bf16.msra.mxu0 %v3856_v26  ;;  %v3891_v26 = vld [vmem:[#allocation10 + $0x2c] ss:$16 sps:$4 sm:$0xff]  }
 0x112   :  { %937 = vmatprep.subr.bf16.mxu0 %v3864_v28  ;;  %v3889_v28 = vld [vmem:[#allocation10 + $0x28] ss:$16 sps:$4 sm:$0xff]  }
 0x113   :  { %1428 = vmatpush1.bf16.msra.mxu1 %v3871_v34  ;;  %v3903_v34 = vld [vmem:[#allocation10 + $0x6c] ss:$16 sps:$4 sm:$0xff]  }
 0x114   :  { %1429 = vmatprep.subr.bf16.mxu1 %v3879_v35  ;;  %v3898_v35 = vld [vmem:[#allocation8 + $0x150] ss:$8 sps:$4 sm:$0xff]  }
 0x115   :  { %938 = vmatpush1.bf16.msra.mxu0 %v3862_v30  ;;  %v3897_v30 = vld [vmem:[#allocation10 + $0x4c] ss:$16 sps:$4 sm:$0xff]  }
 0x116   :  { %948 = vmatprep.subr.bf16.mxu0 %v3870_v32  ;;  %v3895_v32 = vld [vmem:[#allocation10 + $0x48] ss:$16 sps:$4 sm:$0xff]  }
 0x117   :  { %1430 = vmatpush1.bf16.msra.mxu1 %v3877_v36  ;;  %v3901_v36 = vld [vmem:[#allocation10 + $0x68] ss:$16 sps:$4 sm:$0xff]  }
 0x118   :  { %1440 = vmatprep.subr.bf16.mxu1 %v3885_v37  ;;  %v3906_v37 = vld [vmem:[#allocation8 + $0x164] ss:$8 sps:$4 sm:$0xff]  }
 0x1a3   :  { %v369_v46 = vpop.f32.mrb[0].mxu0 }
 0x1a4   :  { %v370_v48 = vadd.f32 %v369_v46, %v209_v44  ;;  %v371_v49 = vpop.f32.mrb[1].mxu0  ;;  %v3909_v44 = vld [vmem:[#allocation10 + $0x8c] ss:$16 sps:$4 sm:$0xff]   ;;  %v3907_v46 = vld [vmem:[#allocation10 + $0x88] ss:$16 sps:$4 sm:$0xff]  }
 0x1a5   :  { %v372_v51 = vadd.f32 %v371_v49, %v213_v45  ;;  %v373_v52 = vpop.f32.mrb[2].mxu0  ;;  %v4773_v54 = vpop.f32.mrb[0].mxu1  ;;  %v3904_v45 = vld [vmem:[#allocation8 + $0x160] ss:$8 sps:$4 sm:$0xff]   ;;  %v3910_v49 = vld [vmem:[#allocation8 + $0x170] ss:$8 sps:$4 sm:$0xff]  }
 0x1a6   :  { %v499_v55 = vmax.f32 %v370_v48, 0.0  ;;  %v374_v56 = vpop.f32.mrb[3].mxu0  ;;  %v412_v57 = vpop.f32.mrb[1].mxu1  ;;  %v3915_v48 = vld [vmem:[#allocation10 + $0xac] ss:$16 sps:$4 sm:$0xff]  }
 0x1a7   :  { %v500_v58 = vmax.f32 %v372_v51, 0.0  ;;  %v413_v59 = vadd.f32 %v412_v57, %v221_v47  ;;  %v414_v60 = vpop.f32.mrb[2].mxu1  ;;  %v3912_v47 = vld [vmem:[#allocation8 + $0x174] ss:$8 sps:$4 sm:$0xff]   ;;  %v3918_v51 = vld [vmem:[#allocation8 + $0x184] ss:$8 sps:$4 sm:$0xff]  }
 0x1a8   :  { %v415_v62 = vpop.f32.mrb[3].mxu1  ;;  %v503_v4 = vpack.c.bf16 %v499_v55, %v499_v55  ;;  %v3921_v52 = vld [vmem:[#allocation10 + $0xcc] ss:$16 sps:$4 sm:$0xff]   ;;  %v3919_v55 = vld [vmem:[#allocation10 + $0xc8] ss:$16 sps:$4 sm:$0xff]  }
 0x1a9   :  { %v504_v63 = vpack.c.bf16 %v500_v58, %v500_v58  ;;  %v502_v3 = vmax.f32 %v413_v59, 0.0  ;;  %v3924_v56 = vld [vmem:[#allocation8 + $0x194] ss:$8 sps:$4 sm:$0xff]   ;;  %v3922_v58 = vld [vmem:[#allocation8 + $0x190] ss:$8 sps:$4 sm:$0xff]  }
 0x1aa   :  { %v3927_v57 = vld [vmem:[#allocation10 + $0xec] ss:$16 sps:$4 sm:$0xff]   ;;  %v3925_v59 = vld [vmem:[#allocation10 + $0xe8] ss:$16 sps:$4 sm:$0xff]  }
 0x1ab   :  { %v451_v6 = vpop.f32.mrb[4].mxu0  ;;  %939 = vmatprep.mubr.bf16.mxu0 %v504_v63  ;;  %v506_v7 = vpack.c.bf16 %v502_v3, %v502_v3  ;;  %v3930_v60 = vld [vmem:[#allocation8 + $0x1a4] ss:$8 sps:$4 sm:$0xff]   ;;  %v3928_v62 = vld [vmem:[#allocation8 + $0x1a0] ss:$8 sps:$4 sm:$0xff]  }
 0x1ac   :  { %v452_v8 = vadd.f32 %v451_v6, %v225_v61  ;;  %v453_v9 = vpop.f32.mrb[5].mxu0  ;;  %940 = vmatmul.mubr.bf16.vlgmr.msra.gmra.mrb[8].mxu0 %v503_v4  ;;  %v3933_v61 = vld [vmem:[#allocation10 + $0x10c] ss:$16 sps:$4 sm:$0xff]   ;;  %v3931_v63 = vld [vmem:[#allocation10 + $0x108] ss:$16 sps:$4 sm:$0xff]  }
 0x1ad   :  { %v454_v10 = vadd.f32 %v453_v9, %v229_v2  ;;  %949 = vmatpush1.bf16.msra.mxu0 %v3868_v1  ;;  %v455_v11 = vpop.f32.mrb[6].mxu0  ;;  %980 = vmatprep.mubr.bf16.mxu0 %v506_v7  ;;  %v4777_v13 = vpop.f32.mrb[4].mxu1  ;;  %v3936_v1 = vld [vmem:[#allocation8 + $0x1b4] ss:$8 sps:$4 sm:$0xff]   ;;  %v3934_v3 = vld [vmem:[#allocation8 + $0x1b0] ss:$8 sps:$4 sm:$0xff]  }
 0x1ae   :  { %v507_v14 = vmax.f32 %v452_v8, 0.0  ;;  %v456_v15 = vpop.f32.mrb[7].mxu0  ;;  %950 = vmatprep.subr.bf16.mxu0 %v3876_v5  ;;  %v4779_v17 = vpop.f32.mrb[5].mxu1  ;;  %v3939_v2 = vld [vmem:[#allocation10 + $0x12c] ss:$16 sps:$4 sm:$0xff]   ;;  %v4785_v7 = vsub.s32 2, %v4752_v39 }
 0x1af   :  { %v508_v18 = vmax.f32 %v454_v10, 0.0  ;;  %v496_v19 = vpop.f32.mrb[6].mxu1  ;;  %v3937_v4 = vld [vmem:[#allocation10 + $0x128] ss:$16 sps:$4 sm:$0xff]   ;;  %v3942_v5 = vld [vmem:[#allocation8 + $0x1c4] ss:$8 sps:$4 sm:$0xff]  }
 0x1b0   :  { %v497_v20 = vpop.f32.mrb[7].mxu1  ;;  %v4781_v24 = vpack.c.bf16 %v507_v14, %v507_v14  ;;  %v3945_v6 = vld [vmem:[#allocation10 + $0x14c] ss:$16 sps:$4 sm:$0xff]   ;;  %v3940_v8 = vld [vmem:[#allocation8 + $0x1c0] ss:$8 sps:$4 sm:$0xff]  }
 0x1b1   :  { %v510_v21 = vpack.c.bf16 %v508_v18, %v508_v18  ;;  %951 = vmatpush1.bf16.msra.mxu0 %v3874_v12  ;;  %v3943_v9 = vld [vmem:[#allocation10 + $0x148] ss:$16 sps:$4 sm:$0xff]   ;;  %v3948_v10 = vld [vmem:[#allocation8 + $0x1d4] ss:$8 sps:$4 sm:$0xff]   ;;  %v217_v12 = vrot.slane %v4757_v41, %v4785_v7 }
 0x1b2   :  { %952 = vmatprep.subr.bf16.mxu0 %v3882_v16  ;;  %v3951_v11 = vld [vmem:[#allocation10 + $0x16c] ss:$16 sps:$4 sm:$0xff]   ;;  %v3946_v14 = vld [vmem:[#allocation8 + $0x1d0] ss:$8 sps:$4 sm:$0xff]   ;;  %v3952_v20 = vld [vmem:[#allocation8 + $0x1e0] ss:$8 sps:$4 sm:$0xff]  }
 0x1b3   :  { %1431 = vmatprep.mubr.bf16.mxu1 %v510_v21  ;;  %v3949_v15 = vld [vmem:[#allocation10 + $0x168] ss:$16 sps:$4 sm:$0xff]   ;;  %v3954_v16 = vld [vmem:[#allocation8 + $0x1e4] ss:$8 sps:$4 sm:$0xff]   ;;  %v411_v19 = vadd.f32 %v4773_v54, %v217_v12  ;;  %v4070_v12 = vld [vmem:[#allocation14 + $0x50] sm:$0xff]  }
 0x1b4   :  { %1432 = vmatmul.mubr.bf16.vlgmr.msra.gmra.mrb[8].mxu1 %v4781_v24  ;;  %v3957_v18 = vld [vmem:[#allocation10 + $0x18c] ss:$16 sps:$4 sm:$0xff]   ;;  %v3958_v41 = vld [vmem:[#allocation8 + $0x1f0] ss:$8 sps:$4 sm:$0xff]  }
 0x1b5   :  { %953 = vmatpush1.bf16.msra.mxu0 %v3880_v22  ;;  %1441 = vmatpush1.bf16.msra.mxu1 %v3883_v23  ;;  %v3960_v22 = vld [vmem:[#allocation8 + $0x1f4] ss:$8 sps:$4 sm:$0xff]   ;;  %v3964_v54 = vld [vmem:[#allocation10 + $0x1c8] ss:$16 sps:$4 sm:$0xff]  }
 0x1b6   :  { %1472 = vmatprep.mubr.bf16.mxu1 %v510_v21  ;;  %954 = vmatprep.subr.bf16.mxu0 %v3888_v25  ;;  %v3955_v21 = vld [vmem:[#allocation10 + $0x188] ss:$16 sps:$4 sm:$0xff]   ;;  %v3963_v23 = vld [vmem:[#allocation10 + $0x1ac] ss:$16 sps:$4 sm:$0xff]   ;;  %v501_v25 = vmax.f32 %v411_v19, 0.0  ;;  %v4075_v19 = vld [vmem:[#allocation14 + $0x20] sm:$0xff]  }
 0x1b7   :  { %1442 = vmatprep.subr.bf16.mxu1 %v3891_v26  ;;  %v3961_v26 = vld [vmem:[#allocation10 + $0x1a8] ss:$16 sps:$4 sm:$0xff]  }
 0x1b9   :  { %955 = vmatpush1.bf16.msra.mxu0 %v3886_v27  ;;  %1443 = vmatpush1.bf16.msra.mxu1 %v3889_v28  ;;  %v3966_v27 = vld [vmem:[#allocation10 + $0x1cc] ss:$16 sps:$4 sm:$0xff]  }
 0x1ba   :  { %956 = vmatprep.subr.bf16.mxu0 %v3894_v29  ;;  %1444 = vmatprep.subr.bf16.mxu1 %v3897_v30  ;;  %v3972_v28 = vld [vmem:[#allocation11 + $0x4] ss:$8 sps:$4 sm:$0xff]   ;;  %v505_v29 = vpack.c.bf16 %v501_v25, %v501_v25  ;;  %v3970_v30 = vld [vmem:[#allocation11] ss:$8 sps:$4 sm:$0xff]  }
 0x1bd   :  { %957 = vmatpush1.bf16.msra.mxu0 %v3892_v31  ;;  %1445 = vmatpush1.bf16.msra.mxu1 %v3895_v32  ;;  %v3969_v31 = vld [vmem:[#allocation10 + $0x1ec] ss:$16 sps:$4 sm:$0xff]  }
 0x1be   :  { %958 = vmatprep.subr.bf16.mxu0 %v3900_v33  ;;  %1446 = vmatprep.subr.bf16.mxu1 %v3903_v34  ;;  %v3975_v32 = vld [vmem:[#allocation11 + $0x14] ss:$8 sps:$4 sm:$0xff]   ;;  %v3967_v33 = vld [vmem:[#allocation10 + $0x1e8] ss:$16 sps:$4 sm:$0xff]  }
 0x1bf   :  { %v3973_v34 = vld [vmem:[#allocation11 + $0x10] ss:$8 sps:$4 sm:$0xff]  }
 0x1c1   :  { %959 = vmatpush1.bf16.msra.mxu0 %v3898_v35  ;;  %1447 = vmatpush1.bf16.msra.mxu1 %v3901_v36  ;;  %v3978_v35 = vld [vmem:[#allocation11 + $0x24] ss:$8 sps:$4 sm:$0xff]   ;;  %v3976_v36 = vld [vmem:[#allocation11 + $0x20] ss:$8 sps:$4 sm:$0xff]  }
 0x1c2   :  { %960 = vmatprep.subr.bf16.mxu0 %v3906_v37  ;;  %1448 = vmatprep.subr.bf16.mxu1 %v3909_v44  ;;  %v3981_v37 = vld [vmem:[#allocation11 + $0x34] ss:$8 sps:$4 sm:$0xff]   ;;  %v3979_v44 = vld [vmem:[#allocation11 + $0x30] ss:$8 sps:$4 sm:$0xff]  }
 0x1c5   :  { %961 = vmatpush1.bf16.msra.mxu0 %v3904_v45  ;;  %1449 = vmatpush1.bf16.msra.mxu1 %v3907_v46  ;;  %v3984_v45 = vld [vmem:[#allocation11 + $0x44] ss:$8 sps:$4 sm:$0xff]   ;;  %v3982_v46 = vld [vmem:[#allocation11 + $0x40] ss:$8 sps:$4 sm:$0xff]  }
 0x1c6   :  { %962 = vmatprep.subr.bf16.mxu0 %v3912_v47  ;;  %1450 = vmatprep.subr.bf16.mxu1 %v3915_v48  ;;  %v3987_v47 = vld [vmem:[#allocation11 + $0x54] ss:$8 sps:$4 sm:$0xff]   ;;  %v3985_v48 = vld [vmem:[#allocation11 + $0x50] ss:$8 sps:$4 sm:$0xff]  }
 0x1c9   :  { %963 = vmatpush1.bf16.msra.mxu0 %v3910_v49  ;;  %1451 = vmatpush1.bf16.msra.mxu1 %v3913_v50  ;;  %v3990_v49 = vld [vmem:[#allocation11 + $0x64] ss:$8 sps:$4 sm:$0xff]   ;;  %v3988_v50 = vld [vmem:[#allocation11 + $0x60] ss:$8 sps:$4 sm:$0xff]  }
 0x1ca   :  { %964 = vmatprep.subr.bf16.mxu0 %v3918_v51  ;;  %1452 = vmatprep.subr.bf16.mxu1 %v3921_v52  ;;  %v3993_v51 = vld [vmem:[#allocation11 + $0x74] ss:$8 sps:$4 sm:$0xff]   ;;  %v3991_v52 = vld [vmem:[#allocation11 + $0x70] ss:$8 sps:$4 sm:$0xff]  }
 0x1cd   :  { %965 = vmatpush1.bf16.msra.mxu0 %v3916_v53  ;;  %1453 = vmatpush1.bf16.msra.mxu1 %v3919_v55  ;;  %v3994_v53 = vld [vmem:[#allocation11 + $0x80] ss:$8 sps:$4 sm:$0xff]   ;;  %v3999_v55 = vld [vmem:[#allocation11 + $0x94] ss:$8 sps:$4 sm:$0xff]  }
 0x1ce   :  { %966 = vmatprep.subr.bf16.mxu0 %v3924_v56  ;;  %1454 = vmatprep.subr.bf16.mxu1 %v3927_v57  ;;  %v3997_v56 = vld [vmem:[#allocation11 + $0x90] ss:$8 sps:$4 sm:$0xff]   ;;  %v4002_v57 = vld [vmem:[#allocation11 + $0xa4] ss:$8 sps:$4 sm:$0xff]  }
 0x1d1   :  { %967 = vmatpush1.bf16.msra.mxu0 %v3922_v58  ;;  %1455 = vmatpush1.bf16.msra.mxu1 %v3925_v59  ;;  %v4000_v58 = vld [vmem:[#allocation11 + $0xa0] ss:$8 sps:$4 sm:$0xff]   ;;  %v4005_v59 = vld [vmem:[#allocation11 + $0xb4] ss:$8 sps:$4 sm:$0xff]  }
 0x1d2   :  { %968 = vmatprep.subr.bf16.mxu0 %v3930_v60  ;;  %1456 = vmatprep.subr.bf16.mxu1 %v3933_v61  ;;  %v4003_v60 = vld [vmem:[#allocation11 + $0xb0] ss:$8 sps:$4 sm:$0xff]   ;;  %v4008_v61 = vld [vmem:[#allocation11 + $0xc4] ss:$8 sps:$4 sm:$0xff]  }
 0x1d5   :  { %969 = vmatpush1.bf16.msra.mxu0 %v3928_v62  ;;  %1457 = vmatpush1.bf16.msra.mxu1 %v3931_v63  ;;  %v4006_v62 = vld [vmem:[#allocation11 + $0xc0] ss:$8 sps:$4 sm:$0xff]   ;;  %v4011_v63 = vld [vmem:[#allocation11 + $0xd4] ss:$8 sps:$4 sm:$0xff]  }
 0x1d6   :  { %970 = vmatprep.subr.bf16.mxu0 %v3936_v1  ;;  %1458 = vmatprep.subr.bf16.mxu1 %v3939_v2  ;;  %v4009_v1 = vld [vmem:[#allocation11 + $0xd0] ss:$8 sps:$4 sm:$0xff]   ;;  %v4014_v2 = vld [vmem:[#allocation11 + $0xe4] ss:$8 sps:$4 sm:$0xff]  }
 0x1d9   :  { %971 = vmatpush1.bf16.msra.mxu0 %v3934_v3  ;;  %1459 = vmatpush1.bf16.msra.mxu1 %v3937_v4  ;;  %v4012_v3 = vld [vmem:[#allocation11 + $0xe0] ss:$8 sps:$4 sm:$0xff]   ;;  %v4017_v4 = vld [vmem:[#allocation11 + $0xf4] ss:$8 sps:$4 sm:$0xff]  }
 0x1da   :  { %972 = vmatprep.subr.bf16.mxu0 %v3942_v5  ;;  %1460 = vmatprep.subr.bf16.mxu1 %v3945_v6  ;;  %v4015_v5 = vld [vmem:[#allocation11 + $0xf0] ss:$8 sps:$4 sm:$0xff]   ;;  %v4020_v6 = vld [vmem:[#allocation11 + $0x104] ss:$8 sps:$4 sm:$0xff]  }
 0x1dd   :  { %973 = vmatpush1.bf16.msra.mxu0 %v3940_v8  ;;  %1461 = vmatpush1.bf16.msra.mxu1 %v3943_v9  ;;  %v4066_v8 = vld [vmem:[#allocation14 + $0x40] sm:$0xff]  }
 0x1de   :  { %974 = vmatprep.subr.bf16.mxu0 %v3948_v10  ;;  %1462 = vmatprep.subr.bf16.mxu1 %v3951_v11  ;;  %v4067_v9 = vld [vmem:[#allocation14] sm:$0xff]   ;;  %v4068_v10 = vld [vmem:[#allocation14 + $0x48] sm:$0xff]  }
 0x1df   :  { %v4069_v11 = vld [vmem:[#allocation14 + $0x8] sm:$0xff]  }
 0x1e1   :  { %975 = vmatpush1.bf16.msra.mxu0 %v3946_v14  ;;  %1463 = vmatpush1.bf16.msra.mxu1 %v3949_v15  ;;  %v4071_v14 = vld [vmem:[#allocation14 + $0x10] sm:$0xff]   ;;  %v4072_v15 = vld [vmem:[#allocation14 + $0x58] sm:$0xff]  }
 0x1e2   :  { %976 = vmatprep.subr.bf16.mxu0 %v3954_v16  ;;  %1464 = vmatprep.subr.bf16.mxu1 %v3957_v18  ;;  %v4073_v16 = vld [vmem:[#allocation14 + $0x18] sm:$0xff]   ;;  %v4074_v18 = vld [vmem:[#allocation14 + $0x60] sm:$0xff]  }
 0x1e5   :  { %977 = vmatpush1.bf16.msra.mxu0 %v3952_v20  ;;  %1465 = vmatpush1.bf16.msra.mxu1 %v3955_v21  ;;  %v4076_v20 = vld [vmem:[#allocation14 + $0x68] sm:$0xff]  }
 0x1e6   :  { %978 = vmatprep.subr.bf16.mxu0 %v3960_v22  ;;  %1466 = vmatprep.subr.bf16.mxu1 %v3963_v23  ;;  %v4077_v21 = vld [vmem:[#allocation14 + $0x28] sm:$0xff]   ;;  %v4794_v22 = vld [vmem:[%s4864_s6] sm:$0xf] }
 0x1e7   :  { %v1062_v23 = vrot.slane %v4794_v22, %v4755_v40  ;;  %v1066_v25 = vrot.slane %v4794_v22, %v4760_v42 }
 0x1e9   :  { %979 = vmatpush1.bf16.msra.mxu0 %v3958_v41  ;;  %1467 = vmatpush1.bf16.msra.mxu1 %v3961_v26 }
 0x1ea   :  { %1468 = vmatprep.subr.bf16.mxu1 %v3966_v27  ;;  %1885 = vmatprep.subr.bf16.mxu0 %v3972_v28 }
 0x1ec   :  { %981 = vmatmul.mubr.bf16.vlgmr.msra.gmra.mrb[8].mxu0 %v505_v29 }
 0x1ed   :  { %1469 = vmatpush1.bf16.msra.mxu1 %v3964_v54  ;;  %1886 = vmatpush1.bf16.msra.mxu0 %v3970_v30 }
 0x1ee   :  { %1470 = vmatprep.subr.bf16.mxu1 %v3969_v31  ;;  %1887 = vmatprep.subr.bf16.mxu0 %v3975_v32 }
 0x1f1   :  { %1471 = vmatpush1.bf16.msra.mxu1 %v3967_v33  ;;  %1888 = vmatpush1.bf16.msra.mxu0 %v3973_v34  ;;  %v4018_v33 = vld [vmem:[#allocation11 + $0x100] ss:$8 sps:$4 sm:$0xff]  }
 0x1f2   :  { %1889 = vmatprep.subr.bf16.mxu0 %v3978_v35  ;;  %3648 = vmatprep.subr.bf16.mxu1 %v4066_v8  ;;  %v4023_v35 = vld [vmem:[#allocation11 + $0x114] ss:$8 sps:$4 sm:$0xff]  }
 0x1f4   :  { %1473 = vmatmul.mubr.bf16.vlgmr.msra.gmra.mrb[12].mxu1 %v4781_v24  ;;  %v3996_v24 = vld [vmem:[#allocation11 + $0x84] ss:$8 sps:$4 sm:$0xff]  }
 0x1f5   :  { %1890 = vmatpush1.bf16.msra.mxu0 %v3976_v36  ;;  %3649 = vmatpush3.bf16.msra.mxu1 %v4067_v9  ;;  %v4021_v36 = vld [vmem:[#allocation11 + $0x110] ss:$8 sps:$4 sm:$0xff]   ;;  %v4062_v9 = vld [vmem:[#allocation11 + $0x1e4] ss:$8 sps:$4 sm:$0xff]  }
 0x1f6   :  { %1891 = vmatprep.subr.bf16.mxu0 %v3981_v37  ;;  %3650 = vmatprep.subr.bf16.mxu1 %v4068_v10  ;;  %v4026_v37 = vld [vmem:[#allocation11 + $0x124] ss:$8 sps:$4 sm:$0xff]   ;;  %v1070_v10 = vrot.slane %v4794_v22, %v4785_v7 }
 0x1f9   :  { %1892 = vmatpush1.bf16.msra.mxu0 %v3979_v44  ;;  %3651 = vmatpush3.bf16.msra.mxu1 %v4069_v11  ;;  %v4024_v44 = vld [vmem:[#allocation11 + $0x120] ss:$8 sps:$4 sm:$0xff]   ;;  %v1074_v11 = vrot.slane %v4794_v22, %v4763_v43  ;;  %v4078_v22 = vld [vmem:[#allocation14 + $0x70] sm:$0xff]  }
 0x1fa   :  { %1893 = vmatprep.subr.bf16.mxu0 %v3984_v45  ;;  %3652 = vmatprep.subr.bf16.mxu1 %v4070_v12  ;;  %v4029_v45 = vld [vmem:[#allocation11 + $0x134] ss:$8 sps:$4 sm:$0xff]   ;;  %v4060_v12 = vld [vmem:[#allocation11 + $0x1e0] ss:$8 sps:$4 sm:$0xff]  }
 0x1fd   :  { %1894 = vmatpush1.bf16.msra.mxu0 %v3982_v46  ;;  %3653 = vmatpush3.bf16.msra.mxu1 %v4071_v14  ;;  %v4027_v46 = vld [vmem:[#allocation11 + $0x130] ss:$8 sps:$4 sm:$0xff]   ;;  %v4065_v14 = vld [vmem:[#allocation11 + $0x1f4] ss:$8 sps:$4 sm:$0xff]  }
 0x1fe   :  { %1895 = vmatprep.subr.bf16.mxu0 %v3987_v47  ;;  %3654 = vmatprep.subr.bf16.mxu1 %v4072_v15  ;;  %v4032_v47 = vld [vmem:[#allocation11 + $0x144] ss:$8 sps:$4 sm:$0xff]  }
 0x201   :  { %1896 = vmatpush1.bf16.msra.mxu0 %v3985_v48  ;;  %3655 = vmatpush3.bf16.msra.mxu1 %v4073_v16  ;;  %v4030_v48 = vld [vmem:[#allocation11 + $0x140] ss:$8 sps:$4 sm:$0xff]  }
 0x202   :  { %1897 = vmatprep.subr.bf16.mxu0 %v3990_v49  ;;  %3656 = vmatprep.subr.bf16.mxu1 %v4074_v18  ;;  %v4035_v49 = vld [vmem:[#allocation11 + $0x154] ss:$8 sps:$4 sm:$0xff]  }
 0x205   :  { %1898 = vmatpush1.bf16.msra.mxu0 %v3988_v50  ;;  %3657 = vmatpush3.bf16.msra.mxu1 %v4075_v19  ;;  %v4033_v50 = vld [vmem:[#allocation11 + $0x150] ss:$8 sps:$4 sm:$0xff]  }
 0x206   :  { %1899 = vmatprep.subr.bf16.mxu0 %v3993_v51  ;;  %3658 = vmatprep.subr.bf16.mxu1 %v4076_v20  ;;  %v4038_v51 = vld [vmem:[#allocation11 + $0x164] ss:$8 sps:$4 sm:$0xff]  }
 0x209   :  { %1900 = vmatpush1.bf16.msra.mxu0 %v3991_v52  ;;  %3659 = vmatpush3.bf16.msra.mxu1 %v4077_v21  ;;  %v4036_v52 = vld [vmem:[#allocation11 + $0x160] ss:$8 sps:$4 sm:$0xff]   ;;  %v4063_v21 = vld [vmem:[#allocation11 + $0x1f0] ss:$8 sps:$4 sm:$0xff]  }
 0x20a   :  { %1901 = vmatprep.subr.bf16.mxu0 %v3996_v24  ;;  %v4041_v24 = vld [vmem:[#allocation11 + $0x174] ss:$8 sps:$4 sm:$0xff]   ;;  %3660 = vmatprep.subr.bf16.mxu1 %v4078_v22 }
 0x20d   :  { %1902 = vmatpush1.bf16.msra.mxu0 %v3994_v53  ;;  %v4039_v53 = vld [vmem:[#allocation11 + $0x170] ss:$8 sps:$4 sm:$0xff]  }
 0x20e   :  { %1903 = vmatprep.subr.bf16.mxu0 %v3999_v55  ;;  %v4044_v55 = vld [vmem:[#allocation11 + $0x184] ss:$8 sps:$4 sm:$0xff]  }
 0x211   :  { %1904 = vmatpush1.bf16.msra.mxu0 %v3997_v56  ;;  %v4042_v56 = vld [vmem:[#allocation11 + $0x180] ss:$8 sps:$4 sm:$0xff]  }
 0x212   :  { %1905 = vmatprep.subr.bf16.mxu0 %v4002_v57  ;;  %v4047_v57 = vld [vmem:[#allocation11 + $0x194] ss:$8 sps:$4 sm:$0xff]  }
 0x215   :  { %1906 = vmatpush1.bf16.msra.mxu0 %v4000_v58  ;;  %v4045_v58 = vld [vmem:[#allocation11 + $0x190] ss:$8 sps:$4 sm:$0xff]  }
 0x216   :  { %1907 = vmatprep.subr.bf16.mxu0 %v4005_v59  ;;  %v4050_v59 = vld [vmem:[#allocation11 + $0x1a4] ss:$8 sps:$4 sm:$0xff]  }
 0x219   :  { %1908 = vmatpush1.bf16.msra.mxu0 %v4003_v60  ;;  %v4048_v60 = vld [vmem:[#allocation11 + $0x1a0] ss:$8 sps:$4 sm:$0xff]  }
 0x21a   :  { %1909 = vmatprep.subr.bf16.mxu0 %v4008_v61  ;;  %v4053_v61 = vld [vmem:[#allocation11 + $0x1b4] ss:$8 sps:$4 sm:$0xff]  }
 0x21d   :  { %1910 = vmatpush1.bf16.msra.mxu0 %v4006_v62  ;;  %v4051_v62 = vld [vmem:[#allocation11 + $0x1b0] ss:$8 sps:$4 sm:$0xff]  }
 0x21e   :  { %1911 = vmatprep.subr.bf16.mxu0 %v4011_v63  ;;  %v4056_v63 = vld [vmem:[#allocation11 + $0x1c4] ss:$8 sps:$4 sm:$0xff]  }
 0x221   :  { %1912 = vmatpush1.bf16.msra.mxu0 %v4009_v1  ;;  %v4054_v1 = vld [vmem:[#allocation11 + $0x1c0] ss:$8 sps:$4 sm:$0xff]  }
 0x222   :  { %1913 = vmatprep.subr.bf16.mxu0 %v4014_v2  ;;  %v4059_v2 = vld [vmem:[#allocation11 + $0x1d4] ss:$8 sps:$4 sm:$0xff]  }
 0x225   :  { %1914 = vmatpush1.bf16.msra.mxu0 %v4012_v3 }
 0x226   :  { %1915 = vmatprep.subr.bf16.mxu0 %v4017_v4 }
 0x229   :  { %1916 = vmatpush1.bf16.msra.mxu0 %v4015_v5 }
 0x22a   :  { %1926 = vmatprep.subr.bf16.mxu0 %v4020_v6  ;;  %v4057_v6 = vld [vmem:[#allocation11 + $0x1d0] ss:$8 sps:$4 sm:$0xff]  }
 0x287   :  { %v1433_v41 = vpop.f32.mrb[8].mxu1 }
 0x288   :  { %v1434_v26 = vadd.f32 %v1433_v41, %v1062_v23  ;;  %v1435_v27 = vpop.f32.mrb[9].mxu1 }
 0x289   :  { %v1436_v28 = vadd.f32 %v1435_v27, %v1066_v25  ;;  %v1437_v29 = vpop.f32.mrb[10].mxu1 }
 0x28a   :  { %v1481_v54 = vmax.f32 %v1434_v26, 0.0  ;;  %v1438_v30 = vpop.f32.mrb[11].mxu1  ;;  %v4080_v29 = vld [vmem:[#allocation14 + $0x78] sm:$0xff]  }
 0x28b   :  { %v1482_v31 = vmax.f32 %v1436_v28, 0.0  ;;  %v4079_v28 = vld [vmem:[#allocation14 + $0x30] sm:$0xff]   ;;  %v4082_v30 = vld [vmem:[#allocation13 + $0x40] sm:$0xff]  }
 0x28c   :  { %v1485_v34 = vpack.c.bf16 %v1481_v54, %v1481_v54  ;;  %3661 = vmatpush3.bf16.msra.mxu1 %v4079_v28  ;;  %v4081_v54 = vld [vmem:[#allocation14 + $0x38] sm:$0xff]  }
 0x28d   :  { %v1486_v32 = vpack.c.bf16 %v1482_v31, %v1482_v31  ;;  %3662 = vmatprep.subr.bf16.mxu1 %v4080_v29  ;;  %v575_v31 = vld [vmem:[%s4862_s4] sm:$0x3] }
 0x28f   :  { %1917 = vmatprep.mubr.bf16.mxu0 %v1486_v32  ;;  %v1553_v32 = vld [vmem:[%s4866_s8] sm:$0x3] }
 0x290   :  { %1918 = vmatmul.mubr.bf16.vlgmr.msra.gmra.mrb[12].mxu0 %v1485_v34  ;;  %3663 = vmatpush3.bf16.msra.mxu1 %v4081_v54  ;;  %v1558_v34 = vrot.slane %v1553_v32, %v4755_v40  ;;  %v4230_v54 = vld [vmem:[#allocation2] sm:$0xff] }
 0x291   :  { %1927 = vmatpush1.bf16.msra.mxu0 %v4018_v33  ;;  %3670 = vmatprep.subr.bf16.mxu1 %v4082_v30  ;;  %v584_v33 = vrot.slane %v575_v31, %v4760_v42 }
 0x292   :  { %1928 = vmatprep.subr.bf16.mxu0 %v4023_v35  ;;  %v1562_v35 = vrot.slane %v1553_v32, %v4760_v42 }
 0x295   :  { %1929 = vmatpush1.bf16.msra.mxu0 %v4021_v36 }
 0x296   :  { %1930 = vmatprep.subr.bf16.mxu0 %v4026_v37 }
 0x299   :  { %1931 = vmatpush1.bf16.msra.mxu0 %v4024_v44 }
 0x29a   :  { %1932 = vmatprep.subr.bf16.mxu0 %v4029_v45 }
 0x29d   :  { %1933 = vmatpush1.bf16.msra.mxu0 %v4027_v46 }
 0x29e   :  { %1934 = vmatprep.subr.bf16.mxu0 %v4032_v47 }
 0x2a1   :  { %1935 = vmatpush1.bf16.msra.mxu0 %v4030_v48 }
 0x2a2   :  { %1936 = vmatprep.subr.bf16.mxu0 %v4035_v49 }
 0x2a5   :  { %1937 = vmatpush1.bf16.msra.mxu0 %v4033_v50 }
 0x2a6   :  { %1938 = vmatprep.subr.bf16.mxu0 %v4038_v51 }
 0x2a9   :  { %1939 = vmatpush1.bf16.msra.mxu0 %v4036_v52 }
 0x2aa   :  { %1940 = vmatprep.subr.bf16.mxu0 %v4041_v24  ;;  %v4083_v24 = vld [vmem:[#allocation13] sm:$0xff]  }
 0x2ad   :  { %1941 = vmatpush1.bf16.msra.mxu0 %v4039_v53 }
 0x2ae   :  { %1942 = vmatprep.subr.bf16.mxu0 %v4044_v55  ;;  %v4084_v55 = vld [vmem:[#allocation13 + $0x48] sm:$0xff]  }
 0x2b1   :  { %1943 = vmatpush1.bf16.msra.mxu0 %v4042_v56 }
 0x2b2   :  { %1944 = vmatprep.subr.bf16.mxu0 %v4047_v57  ;;  %v4085_v57 = vld [vmem:[#allocation13 + $0x8] sm:$0xff]  }
 0x2b5   :  { %1945 = vmatpush1.bf16.msra.mxu0 %v4045_v58  ;;  %v4086_v58 = vld [vmem:[#allocation13 + $0x50] sm:$0xff]  }
 0x2b6   :  { %1946 = vmatprep.subr.bf16.mxu0 %v4050_v59  ;;  %v4087_v59 = vld [vmem:[#allocation13 + $0x10] sm:$0xff]  }
 0x2b9   :  { %1947 = vmatpush1.bf16.msra.mxu0 %v4048_v60  ;;  %v4088_v60 = vld [vmem:[#allocation13 + $0x58] sm:$0xff]  }
 0x2ba   :  { %1948 = vmatprep.subr.bf16.mxu0 %v4053_v61  ;;  %v4089_v61 = vld [vmem:[#allocation13 + $0x18] sm:$0xff]  }
 0x2bd   :  { %1949 = vmatpush1.bf16.msra.mxu0 %v4051_v62  ;;  %v4090_v62 = vld [vmem:[#allocation13 + $0x60] sm:$0xff]  }
 0x2be   :  { %1950 = vmatprep.subr.bf16.mxu0 %v4056_v63  ;;  %v4091_v63 = vld [vmem:[#allocation13 + $0x20] sm:$0xff]  }
 0x2bf   :  { %v4800_v3 = vpop.f32.mrb[8].mxu0 }
 0x2c0   :  { %v984_v4 = vpop.f32.mrb[9].mxu0 }
 0x2c1   :  { %v986_v5 = vpop.f32.mrb[10].mxu0  ;;  %1951 = vmatpush1.bf16.msra.mxu0 %v4054_v1  ;;  %v3737_v36 = vadd.f32 %v984_v4, %v584_v33  ;;  %v4092_v1 = vld [vmem:[#allocation13 + $0x68] sm:$0xff]   ;;  %v580_v4 = vrot.slane %v575_v31, %v4755_v40  ;;  %v2333_v31 = vld [vmem:[%s4870_s12] sm:$0xff] }
 0x2c2   :  { %v987_v8 = vpop.f32.mrb[11].mxu0  ;;  %1952 = vmatprep.subr.bf16.mxu0 %v4059_v2  ;;  %v4093_v2 = vld [vmem:[#allocation13 + $0x28] sm:$0xff]   ;;  %v4094_v5 = vld [vmem:[#allocation13 + $0x70] sm:$0xff]   ;;  %v3544_v32 = vcombine.high %v2333_v31, %v2333_v31  ;;  %v3543_v33 = vcombine.low %v2333_v31, %v2333_v31 }
 0x2c3   :  { %v990_v50 = vmax.f32 %v3737_v36, 0.0  ;;  %v3736_v8 = vadd.f32 %v4800_v3, %v580_v4  ;;  %v4165_v4 = vld [vmem:[#allocation16 + $0x14c] ss:$16 sps:$4 sm:$0xff]   ;;  %v4156_v31 = vld [vmem:[#allocation16 + $0x124] ss:$16 sps:$4 sm:$0xff]  }
 0x2c5   :  { %1953 = vmatpush1.bf16.msra.mxu0 %v4057_v6  ;;  %v992_v56 = vpack.c.bf16 %v990_v50, %v990_v50  ;;  %v4095_v6 = vld [vmem:[#allocation13 + $0x30] sm:$0xff]  }
 0x2c6   :  { %1954 = vmatprep.subr.bf16.mxu0 %v4062_v9  ;;  %v4096_v9 = vld [vmem:[#allocation13 + $0x78] sm:$0xff]  }
 0x2c7   :  { %v1474_v15 = vpop.f32.mrb[12].mxu1 }
 0x2c8   :  { %v1475_v16 = vadd.f32 %v1474_v15, %v1070_v10  ;;  %v1476_v18 = vpop.f32.mrb[13].mxu1  ;;  %v4097_v10 = vld [vmem:[#allocation13 + $0x38] sm:$0xff]  }
 0x2c9   :  { %v1477_v19 = vadd.f32 %v1476_v18, %v1074_v11  ;;  %v1478_v20 = vpop.f32.mrb[14].mxu1  ;;  %1955 = vmatpush1.bf16.msra.mxu0 %v4060_v12  ;;  %v989_v11 = vmax.f32 %v3736_v8, 0.0  ;;  %v4169_v8 = vld [vmem:[#allocation16 + $0x168] ss:$16 sps:$4 sm:$0xff]  }
 0x2ca   :  { %v1483_v23 = vmax.f32 %v1475_v16, 0.0  ;;  %v1479_v25 = vpop.f32.mrb[15].mxu1  ;;  %1956 = vmatprep.subr.bf16.mxu0 %v4065_v14 }
 0x2cb   :  { %v1484_v41 = vmax.f32 %v1477_v19, 0.0  ;;  %v991_v12 = vpack.c.bf16 %v989_v11, %v989_v11  ;;  %v3542_v25 = vld [vmem:[%s4869_s11] ss:$0 sm:$0xff]  ;;  %s4508_s11 = smov 112   ;;  %v4183_v11 = vld [vmem:[#allocation16 + $0x1ac] ss:$16 sps:$4 sm:$0xff]  }
 0x2cc   :  { %v1487_v27 = vpack.c.bf16 %v1483_v23, %v1483_v23 }
 0x2cd   :  { %v1488_v26 = vpack.c.bf16 %v1484_v41, %v1484_v41  ;;  %1957 = vmatpush1.bf16.msra.mxu0 %v4063_v21 }
 0x2cf   :  { %1958 = vmatprep.mubr.bf16.mxu0 %v1488_v26 }
 0x2d0   :  { %1959 = vmatmul.mubr.bf16.vlgmr.msra.gmra.mrb[12].mxu0 %v1487_v27 }
 0x3a3   :  { %v1960_v37 = vpop.f32.mrb[12].mxu0 }
 0x3a4   :  { %v3738_v44 = vadd.f32 %v1960_v37, %v1558_v34  ;;  %v1962_v45 = vpop.f32.mrb[13].mxu0  ;;  %v2347_v34 = vsel %vm310_vm0, %v3543_v33, 0  ;;  %v4102_v37 = vld [vmem:[#allocation16 + $0x4] ss:$16 sps:$4 sm:$0xff]  }
 0x3a5   :  { %v3739_v46 = vadd.f32 %v1962_v45, %v1562_v35  ;;  %v1964_v47 = vpop.f32.mrb[14].mxu0  ;;  %v4105_v45 = vld [vmem:[#allocation16 + $0xc] ss:$16 sps:$4 sm:$0xff]   ;;  %v4162_v33 = vld [vmem:[#allocation16 + $0x144] ss:$16 sps:$4 sm:$0xff]  }
 0x3a6   :  { %v1967_v48 = vmax.f32 %v3738_v44, 0.0  ;;  %v1965_v49 = vpop.f32.mrb[15].mxu0  ;;  %v4103_v44 = vld [vmem:[#allocation16 + $0x8] ss:$16 sps:$4 sm:$0xff]   ;;  %2868 = vmatprep.subr.bf16.mxu0 %v4105_v45  ;;  %v4180_v45 = vld [vmem:[#allocation16 + $0x1a4] ss:$16 sps:$4 sm:$0xff]  }
 0x3a7   :  { %v1968_v51 = vmax.f32 %v3739_v46, 0.0  ;;  %v4111_v46 = vld [vmem:[#allocation16 + $0x2c] ss:$16 sps:$4 sm:$0xff]   ;;  %2869 = vmatpush1.bf16.msra.mxu0 %v4103_v44  ;;  %v4109_v47 = vld [vmem:[#allocation16 + $0x28] ss:$16 sps:$4 sm:$0xff]  }
 0x3a8   :  { %v1969_v53 = vpack.c.bf16 %v1967_v48, %v1967_v48  ;;  %2870 = vmatprep.subr.bf16.mxu0 %v4111_v46  ;;  %v4117_v48 = vld [vmem:[#allocation16 + $0x4c] ss:$16 sps:$4 sm:$0xff]   ;;  %v4115_v49 = vld [vmem:[#allocation16 + $0x48] ss:$16 sps:$4 sm:$0xff]   ;;  %v4172_v44 = vld [vmem:[#allocation16 + $0x180] ss:$16 sps:$4 sm:$0xff]  }
 0x3a9   :  { %v1970_v52 = vpack.c.bf16 %v1968_v51, %v1968_v51  ;;  %v4123_v51 = vld [vmem:[#allocation16 + $0x6c] ss:$16 sps:$4 sm:$0xff]   ;;  %v4178_v46 = vld [vmem:[#allocation16 + $0x1a0] ss:$16 sps:$4 sm:$0xff]  }
 0x3ab   :  { %2163 = vmatprep.mubr.bf16.mxu1 %v1970_v52  ;;  %2871 = vmatpush1.bf16.msra.mxu0 %v4109_v47  ;;  %v4186_v47 = vld [vmem:[#allocation16 + $0x1c4] ss:$16 sps:$4 sm:$0xff]  }
 0x3ac   :  { %2164 = vmatmul.mubr.bf16.vlgmr.msra.gmra.mrb[16].mxu1 %v1969_v53  ;;  %2872 = vmatprep.subr.bf16.mxu0 %v4117_v48  ;;  %v4129_v53 = vld [vmem:[#allocation16 + $0x8c] ss:$16 sps:$4 sm:$0xff]  }
 0x3ad   :  { %3671 = vmatpush3.bf16.msra.mxu1 %v4083_v24  ;;  %2299 = vmatprep.mubr.bf16.mxu1 %v992_v56  ;;  %v4121_v24 = vld [vmem:[#allocation16 + $0x68] ss:$16 sps:$4 sm:$0xff]   ;;  %v4135_v56 = vld [vmem:[#allocation16 + $0xac] ss:$16 sps:$4 sm:$0xff]  }
 0x3ae   :  { %3672 = vmatprep.subr.bf16.mxu1 %v4084_v55  ;;  %v4127_v55 = vld [vmem:[#allocation16 + $0x88] ss:$16 sps:$4 sm:$0xff]   ;;  %v4189_v48 = vld [vmem:[#allocation16 + $0x1cc] ss:$16 sps:$4 sm:$0xff]  }
 0x3af   :  { %2873 = vmatpush1.bf16.msra.mxu0 %v4115_v49  ;;  %v4184_v49 = vld [vmem:[#allocation16 + $0x1c0] ss:$16 sps:$4 sm:$0xff]  }
 0x3b0   :  { %2874 = vmatprep.subr.bf16.mxu0 %v4123_v51  ;;  %v4192_v51 = vld [vmem:[#allocation16 + $0x1e4] ss:$16 sps:$4 sm:$0xff]  }
 0x3b1   :  { %3673 = vmatpush3.bf16.msra.mxu1 %v4085_v57  ;;  %v4133_v57 = vld [vmem:[#allocation16 + $0xa8] ss:$16 sps:$4 sm:$0xff]  }
 0x3b2   :  { %3674 = vmatprep.subr.bf16.mxu1 %v4086_v58  ;;  %v4141_v58 = vld [vmem:[#allocation16 + $0xcc] ss:$16 sps:$4 sm:$0xff]  }
 0x3b3   :  { %2875 = vmatpush1.bf16.msra.mxu0 %v4121_v24  ;;  %v4190_v24 = vld [vmem:[#allocation16 + $0x1e0] ss:$16 sps:$4 sm:$0xff]  }
 0x3b4   :  { %2876 = vmatprep.subr.bf16.mxu0 %v4129_v53  ;;  %v4193_v53 = vld [vmem:[#allocation16 + $0x1e8] ss:$16 sps:$4 sm:$0xff]  }
 0x3b5   :  { %3675 = vmatpush3.bf16.msra.mxu1 %v4087_v59  ;;  %v4139_v59 = vld [vmem:[#allocation16 + $0xc8] ss:$16 sps:$4 sm:$0xff]  }
 0x3b6   :  { %3676 = vmatprep.subr.bf16.mxu1 %v4088_v60  ;;  %v4147_v60 = vld [vmem:[#allocation16 + $0xec] ss:$16 sps:$4 sm:$0xff]  }
 0x3b7   :  { %2877 = vmatpush1.bf16.msra.mxu0 %v4127_v55  ;;  %v4196_v55 = vld [vmem:[#allocation17 + $0x40] sm:$0xff]  }
 0x3b8   :  { %2878 = vmatprep.subr.bf16.mxu0 %v4135_v56  ;;  %v232_v56 = vsub.s32 6, %v4752_v39 }
 0x3b9   :  { %3677 = vmatpush3.bf16.msra.mxu1 %v4089_v61  ;;  %v4145_v61 = vld [vmem:[#allocation16 + $0xe8] ss:$16 sps:$4 sm:$0xff]  }
 0x3ba   :  { %3678 = vmatprep.subr.bf16.mxu1 %v4090_v62  ;;  %v4153_v62 = vld [vmem:[#allocation16 + $0x10c] ss:$16 sps:$4 sm:$0xff]  }
 0x3bb   :  { %2879 = vmatpush1.bf16.msra.mxu0 %v4133_v57  ;;  %v236_v57 = vsub.s32 7, %v4752_v39 }
 0x3bc   :  { %2880 = vmatprep.subr.bf16.mxu0 %v4141_v58  ;;  %v4231_v58 = vld [vmem:[#allocation7] sm:$0xff] }
 0x3bd   :  { %3679 = vmatpush3.bf16.msra.mxu1 %v4091_v63  ;;  %v4151_v63 = vld [vmem:[#allocation16 + $0x108] ss:$16 sps:$4 sm:$0xff]  }
 0x3be   :  { %3680 = vmatprep.subr.bf16.mxu1 %v4092_v1  ;;  %v4159_v1 = vld [vmem:[#allocation16 + $0x12c] ss:$16 sps:$4 sm:$0xff]  }
 0x3bf   :  { %2881 = vmatpush1.bf16.msra.mxu0 %v4139_v59  ;;  %v233_v59 = vrot.slane %v4231_v58, %v232_v56 }
 0x3c0   :  { %2882 = vmatprep.subr.bf16.mxu0 %v4147_v60  ;;  %v237_v60 = vrot.slane %v4231_v58, %v236_v57 }
 0x3c1   :  { %3681 = vmatpush3.bf16.msra.mxu1 %v4093_v2  ;;  %v4157_v2 = vld [vmem:[#allocation16 + $0x128] ss:$16 sps:$4 sm:$0xff]  }
 0x3c2   :  { %3682 = vmatprep.subr.bf16.mxu1 %v4094_v5  ;;  %v4163_v5 = vld [vmem:[#allocation16 + $0x148] ss:$16 sps:$4 sm:$0xff]  }
 0x3c3   :  { %2883 = vmatpush1.bf16.msra.mxu0 %v4145_v61  ;;  %v493_v61 = vadd.f32 %v4777_v13, %v233_v59  ;;  %v4199_v13 = vld [vmem:[#allocation17 + $0x8] sm:$0xff]  }
 0x3c4   :  { %2884 = vmatprep.subr.bf16.mxu0 %v4153_v62  ;;  %v495_v62 = vadd.f32 %v4779_v17, %v237_v60  ;;  %v4200_v17 = vld [vmem:[#allocation17 + $0x50] sm:$0xff]  }
 0x3c5   :  { %3683 = vmatpush3.bf16.msra.mxu1 %v4095_v6  ;;  %v4171_v6 = vld [vmem:[#allocation16 + $0x16c] ss:$16 sps:$4 sm:$0xff]  }
 0x3c6   :  { %3684 = vmatprep.subr.bf16.mxu1 %v4096_v9  ;;  %v4177_v9 = vld [vmem:[#allocation16 + $0x18c] ss:$16 sps:$4 sm:$0xff]  }
 0x3c7   :  { %2885 = vmatpush1.bf16.msra.mxu0 %v4151_v63 }
 0x3c8   :  { %2886 = vmatprep.subr.bf16.mxu0 %v4159_v1 }
 0x3c9   :  { %3685 = vmatpush3.bf16.msra.mxu1 %v4097_v10  ;;  %v4175_v10 = vld [vmem:[#allocation16 + $0x188] ss:$16 sps:$4 sm:$0xff]  }
 0x3ca   :  { %3545 = vmatprep.subr.msk.bf16.mxu1 %vm310_vm0, %v3544_v32  ;;  %v4154_v32 = vld [vmem:[#allocation16 + $0x120] ss:$16 sps:$4 sm:$0xff]  }
 0x3cb   :  { %2887 = vmatpush1.bf16.msra.mxu0 %v4157_v2 }
 0x3cc   :  { %2300 = vmatmul.mubr.bf16.vlgmr.msra.gmra.mrb[20].mxu1 %v991_v12  ;;  %2888 = vmatprep.subr.bf16.mxu0 %v4165_v4  ;;  %v4181_v12 = vld [vmem:[#allocation16 + $0x1a8] ss:$16 sps:$4 sm:$0xff]  }
 0x3cd   :  { %2384 = vmatprep.mubr.bf16.mxu1 %v4506_v0  ;;  %2353 = vmatpush1.bf16.msra.mxu1 %v2347_v34  ;;  %v4160_v34 = vld [vmem:[#allocation16 + $0x140] ss:$16 sps:$4 sm:$0xff]  }
 0x3ce   :  { %2825 = vmatprep.subr.bf16.mxu1 %v4102_v37  ;;  %v4174_v37 = vld [vmem:[#allocation16 + $0x184] ss:$16 sps:$4 sm:$0xff]  }
 0x3cf   :  { %2889 = vmatpush1.bf16.msra.mxu0 %v4163_v5 }
 0x3d0   :  { %2890 = vmatprep.subr.bf16.mxu0 %v4171_v6 }
 0x3d3   :  { %2891 = vmatpush1.bf16.msra.mxu0 %v4169_v8 }
 0x3d4   :  { %2892 = vmatprep.subr.bf16.mxu0 %v4177_v9 }
 0x3d7   :  { %2893 = vmatpush1.bf16.msra.mxu0 %v4175_v10 }
 0x3d8   :  { %2894 = vmatprep.subr.bf16.mxu0 %v4183_v11 }
 0x3db   :  { %2895 = vmatpush1.bf16.msra.mxu0 %v4181_v12 }
 0x3dc   :  { %2896 = vmatprep.subr.bf16.mxu0 %v4189_v48 }
 0x47f   :  { %v3664_v14 = vpop.f32.mrb[16].mxu1 }
 0x480   :  { %v3665_v15 = vpop.f32.mrb[17].mxu1 }
 0x481   :  { %v3666_v16 = vadd.f32 %v3665_v15, %v3664_v14  ;;  %v3667_v18 = vpop.f32.mrb[18].mxu1  ;;  %v4100_v14 = vld [vmem:[#allocation16] ss:$16 sps:$4 sm:$0xff]   ;;  %v4108_v15 = vld [vmem:[#allocation16 + $0x24] ss:$16 sps:$4 sm:$0xff]  }
 0x482   :  { %v3668_v19 = vpop.f32.mrb[19].mxu1  ;;  %v4106_v18 = vld [vmem:[#allocation16 + $0x20] ss:$16 sps:$4 sm:$0xff]  }
 0x483   :  { %v4114_v19 = vld [vmem:[#allocation16 + $0x44] ss:$16 sps:$4 sm:$0xff]  }
 0x49f   :  { %v3686_v20 = vpop.f32.mrb[20].mxu1 }
 0x4a0   :  { %v3687_v21 = vpop.f32.mrb[21].mxu1 }
 0x4a1   :  { %v3688_v23 = vadd.f32 %v3687_v21, %v3686_v20  ;;  %v3689_v3 = vpop.f32.mrb[22].mxu1  ;;  %v4112_v20 = vld [vmem:[#allocation16 + $0x40] ss:$16 sps:$4 sm:$0xff]   ;;  %v4120_v21 = vld [vmem:[#allocation16 + $0x64] ss:$16 sps:$4 sm:$0xff]  }
 0x4a2   :  { %v3690_v41 = vpop.f32.mrb[23].mxu1  ;;  %v4126_v3 = vld [vmem:[#allocation16 + $0x84] ss:$16 sps:$4 sm:$0xff]  }
 0x4a3   :  { %v2302_v26 = vadd.f32 %v3688_v23, %v3666_v16  ;;  %v4118_v23 = vld [vmem:[#allocation16 + $0x60] ss:$16 sps:$4 sm:$0xff]   ;;  %v4132_v41 = vld [vmem:[#allocation16 + $0xa4] ss:$16 sps:$4 sm:$0xff]  }
 0x4a5   :  { %v4821_v27 = vadd.f32 %v3542_v25, %v2302_v26  ;;  %v4124_v25 = vld [vmem:[#allocation16 + $0x80] ss:$16 sps:$4 sm:$0xff]  }
 0x4a6   :  { %v4130_v26 = vld [vmem:[#allocation16 + $0xa0] ss:$16 sps:$4 sm:$0xff]  }
 0x4a7   :  { %v2315_v22 = vmul.f32 0.5, %v4821_v27 }
 0x4a9   :  { %v2316_v0 = vmul.f32 1.442695, %v2315_v22  ;;  %v4138_v22 = vld [vmem:[#allocation16 + $0xc4] ss:$16 sps:$4 sm:$0xff]  }
 0x4ab   :  { %4228 = vpow2.f32 %v2316_v0  ;;  %v4136_v0 = vld [vmem:[#allocation16 + $0xc0] ss:$16 sps:$4 sm:$0xff]  }
 0x4b5   :  { %v4229_v28 = vpop.eup %4228 }
 0x4b6   :  { %2319 = vrot.lane.b32.xlu0 %v4229_v28, %s4507_s27  ;;  %v4144_v28 = vld [vmem:[#allocation16 + $0xe4] ss:$16 sps:$4 sm:$0xff]  }
 0x528   :  { %v2320_v29 = vpop.permute.xlu0 %2319 }
 0x529   :  { %v2322_v30 = vmul.f32 %v4230_v54, %v2320_v29  ;;  %v4142_v29 = vld [vmem:[#allocation16 + $0xe0] ss:$16 sps:$4 sm:$0xff]   ;;  %v4150_v54 = vld [vmem:[#allocation16 + $0x104] ss:$16 sps:$4 sm:$0xff]  }
 0x52b   :  { %2324 = vrot.lane.b32.xlu0 %v2322_v30, %s4507_s27  ;;  %v4148_v30 = vld [vmem:[#allocation16 + $0x100] ss:$16 sps:$4 sm:$0xff]  }
 0x59d   :  { %v2325_v35 = vpop.permute.xlu0 %2324 }
 0x59e   :  { %v2327_v36 = vadd.f32 %v2325_v35, %v4821_v27  ;;  %v4168_v35 = vld [vmem:[#allocation16 + $0x164] ss:$16 sps:$4 sm:$0xff]  }
 0x5a0   :  { %2329 = vrot.lane.b32.xlu1 %v2327_v36, %s4507_s27 }
 0x612   :  { %v2330_v50 = vpop.permute.xlu1 %2329 }
 0x613   :  { %v2332_v52 = vpack.c.bf16 %v2330_v50, %v2327_v36  ;;  %v4166_v36 = vld [vmem:[#allocation16 + $0x160] ss:$16 sps:$4 sm:$0xff]   ;;  %v4187_v50 = vld [vmem:[#allocation16 + $0x1c8] ss:$16 sps:$4 sm:$0xff]  }
 0x614   :  { %2897 = vmatpush1.bf16.msra.mxu0 %v4187_v50 }
 0x615   :  { %2335 = vrot.lane.b32.xlu1 %v2332_v52, %s4508_s11  ;;  %v4195_v52 = vld [vmem:[#allocation16 + $0x1ec] ss:$16 sps:$4 sm:$0xff]  }
 0x616   :  { %2898 = vmatprep.subr.bf16.mxu0 %v4195_v52 }
 0x618   :  { %2899 = vmatpush1.bf16.msra.mxu0 %v4193_v53 }
 0x687   :  { %v2336_v16 = vpop.permute.xlu1 %2335 }
 0x688   :  { %3546 = vmatmul.mubr.msk.bf16.vlgmr.msra.gmra.mrb[24].mxu1 %vm2342_vm2, %v2336_v16  ;;  %v4197_v16 = vld [vmem:[#allocation17] sm:$0xff]  }
 0x689   :  { %2826 = vmatpush1.bf16.msra.mxu1 %v4100_v14 }
 0x68a   :  { %2827 = vmatprep.subr.bf16.mxu1 %v4108_v15 }
 0x68d   :  { %2828 = vmatpush1.bf16.msra.mxu1 %v4106_v18  ;;  %v4198_v18 = vld [vmem:[#allocation17 + $0x48] sm:$0xff]  }
 0x68e   :  { %2829 = vmatprep.subr.bf16.mxu1 %v4114_v19  ;;  %v4201_v19 = vld [vmem:[#allocation17 + $0x10] sm:$0xff]  }
 0x691   :  { %2830 = vmatpush1.bf16.msra.mxu1 %v4112_v20  ;;  %v4202_v20 = vld [vmem:[#allocation17 + $0x58] sm:$0xff]  }
 0x692   :  { %2831 = vmatprep.subr.bf16.mxu1 %v4120_v21  ;;  %v4203_v21 = vld [vmem:[#allocation17 + $0x18] sm:$0xff]  }
 0x695   :  { %2832 = vmatpush1.bf16.msra.mxu1 %v4118_v23  ;;  %v4204_v23 = vld [vmem:[#allocation17 + $0x60] sm:$0xff]  }
 0x696   :  { %2833 = vmatprep.subr.bf16.mxu1 %v4126_v3  ;;  %v4205_v3 = vld [vmem:[#allocation17 + $0x20] sm:$0xff]  }
 0x699   :  { %2834 = vmatpush1.bf16.msra.mxu1 %v4124_v25  ;;  %v4206_v25 = vld [vmem:[#allocation17 + $0x68] sm:$0xff]  }
 0x69a   :  { %2835 = vmatprep.subr.bf16.mxu1 %v4132_v41  ;;  %v4207_v41 = vld [vmem:[#allocation17 + $0x28] sm:$0xff]  }
 0x69d   :  { %2836 = vmatpush1.bf16.msra.mxu1 %v4130_v26  ;;  %v4208_v26 = vld [vmem:[#allocation17 + $0x70] sm:$0xff]  }
 0x69e   :  { %2837 = vmatprep.subr.bf16.mxu1 %v4138_v22  ;;  %v4209_v22 = vld [vmem:[#allocation17 + $0x30] sm:$0xff]  }
 0x6a1   :  { %2838 = vmatpush1.bf16.msra.mxu1 %v4136_v0  ;;  %v4210_v0 = vld [vmem:[#allocation17 + $0x78] sm:$0xff]  }
 0x6a2   :  { %2839 = vmatprep.subr.bf16.mxu1 %v4144_v28  ;;  %v4211_v28 = vld [vmem:[#allocation17 + $0x38] sm:$0xff]  }
 0x6a5   :  { %2840 = vmatpush1.bf16.msra.mxu1 %v4142_v29  ;;  %v4212_v29 = vld [vmem:[#allocation17 + $0xc0] sm:$0xff]  }
 0x6a6   :  { %2841 = vmatprep.subr.bf16.mxu1 %v4150_v54  ;;  %v2479_v54 = vld [vmem:[%s4872_s14] sm:$0xf] }
 0x6a9   :  { %2842 = vmatpush1.bf16.msra.mxu1 %v4148_v30  ;;  %v2484_v30 = vrot.slane %v2479_v54, %v4755_v40 }
 0x6aa   :  { %2843 = vmatprep.subr.bf16.mxu1 %v4156_v31  ;;  %v2492_v31 = vrot.slane %v2479_v54, %v4785_v7 }
 0x6ad   :  { %2844 = vmatpush1.bf16.msra.mxu1 %v4154_v32  ;;  %v2488_v32 = vrot.slane %v2479_v54, %v4760_v42 }
 0x6ae   :  { %2845 = vmatprep.subr.bf16.mxu1 %v4162_v33  ;;  %v2496_v33 = vrot.slane %v2479_v54, %v4763_v43 }
 0x6b1   :  { %2846 = vmatpush1.bf16.msra.mxu1 %v4160_v34 }
 0x6b2   :  { %2847 = vmatprep.subr.bf16.mxu1 %v4168_v35 }
 0x6b5   :  { %2848 = vmatpush1.bf16.msra.mxu1 %v4166_v36 }
 0x6b6   :  { %2849 = vmatprep.subr.bf16.mxu1 %v4174_v37 }
 0x6b9   :  { %2850 = vmatpush1.bf16.msra.mxu1 %v4172_v44 }
 0x6ba   :  { %2851 = vmatprep.subr.bf16.mxu1 %v4180_v45 }
 0x6bd   :  { %2852 = vmatpush1.bf16.msra.mxu1 %v4178_v46 }
 0x6be   :  { %2853 = vmatprep.subr.bf16.mxu1 %v4186_v47 }
 0x6c1   :  { %2854 = vmatpush1.bf16.msra.mxu1 %v4184_v49 }
 0x6c2   :  { %2855 = vmatprep.subr.bf16.mxu1 %v4192_v51 }
 0x6c5   :  { %2856 = vmatpush1.bf16.msra.mxu1 %v4190_v24 }
 0x6c6   :  { %3692 = vmatprep.subr.bf16.mxu1 %v4196_v55 }
 0x75b   :  { %v2386_v63 = vpop.f32.mrb[24].mxu1 }
 0x75c   :  { %v2395_v1 = vadd.f32 %v2386_v63, %v493_v61  ;;  %v2388_v2 = vpop.f32.mrb[25].mxu1 }
 0x75d   :  { %v2396_v4 = vadd.f32 %v2388_v2, %v495_v62  ;;  %v2390_v5 = vpop.f32.mrb[26].mxu1  ;;  %v4214_v2 = vld [vmem:[#allocation17 + $0xc8] sm:$0xff]  }
 0x75e   :  { %v2397_v6 = vadd.f32 %v2390_v5, %v493_v61  ;;  %v2392_v8 = vpop.f32.mrb[27].mxu1  ;;  %v2399_v10 = vmax.f32 %v2395_v1, 0.0  ;;  %v4213_v1 = vld [vmem:[#allocation17 + $0x80] sm:$0xff]   ;;  %v4216_v5 = vld [vmem:[#allocation17 + $0xd0] sm:$0xff]  }
 0x75f   :  { %v2398_v9 = vadd.f32 %v2392_v8, %v495_v62  ;;  %v2400_v12 = vmax.f32 %v2396_v4, 0.0  ;;  %v4215_v4 = vld [vmem:[#allocation17 + $0x88] sm:$0xff]   ;;  %v4218_v8 = vld [vmem:[#allocation17 + $0xd8] sm:$0xff]  }
 0x760   :  { %v2401_v11 = vmax.f32 %v2397_v6, 0.0  ;;  %v4217_v6 = vld [vmem:[#allocation17 + $0x90] sm:$0xff]  }
 0x761   :  { %v2402_v14 = vmax.f32 %v2398_v9, 0.0  ;;  %v4219_v9 = vld [vmem:[#allocation17 + $0x98] sm:$0xff]  }
 0x762   :  { %v3646_v39 = vpack.c.bf16 %v2401_v11, %v2399_v10  ;;  %v4220_v10 = vld [vmem:[#allocation17 + $0xe0] sm:$0xff]  }
 0x763   :  { %v3647_v15 = vpack.c.bf16 %v2402_v14, %v2400_v12  ;;  %v4221_v11 = vld [vmem:[#allocation17 + $0xa0] sm:$0xff]   ;;  %v4222_v12 = vld [vmem:[#allocation17 + $0xe8] sm:$0xff]  }
 0x764   :  { %v4223_v14 = vld [vmem:[#allocation17 + $0xa8] sm:$0xff]  }
 0x765   :  { %2857 = vmatprep.mubr.bf16.mxu1 %v3647_v15  ;;  %2900 = vmatprep.mubr.bf16.mxu0 %v3647_v15  ;;  %v4225_v15 = vld [vmem:[#allocation17 + $0xb0] sm:$0xff]  }
 0x766   :  { %2858 = vmatmul.mubr.bf16.vlgmr.msra.gmra.mrb[28].mxu1 %v3646_v39  ;;  %2901 = vmatmul.mubr.bf16.vlgmr.msra.gmra.mrb[16].mxu0 %v3646_v39  ;;  %v4224_v39 = vld [vmem:[#allocation17 + $0xf0] sm:$0xff]  }
 0x767   :  { %3693 = vmatpush3.bf16.msra.mxu1 %v4197_v16  ;;  %v4226_v16 = vld [vmem:[#allocation17 + $0xf8] sm:$0xff]  }
 0x768   :  { %3694 = vmatprep.subr.bf16.mxu1 %v4198_v18  ;;  %v4227_v18 = vld [vmem:[#allocation17 + $0xb8] sm:$0xff]  }
 0x76b   :  { %3695 = vmatpush3.bf16.msra.mxu1 %v4199_v13 }
 0x76c   :  { %3696 = vmatprep.subr.bf16.mxu1 %v4200_v17 }
 0x76f   :  { %3697 = vmatpush3.bf16.msra.mxu1 %v4201_v19 }
 0x770   :  { %3698 = vmatprep.subr.bf16.mxu1 %v4202_v20 }
 0x773   :  { %3699 = vmatpush3.bf16.msra.mxu1 %v4203_v21 }
 0x774   :  { %3700 = vmatprep.subr.bf16.mxu1 %v4204_v23 }
 0x777   :  { %3701 = vmatpush3.bf16.msra.mxu1 %v4205_v3  ;;  %v3613_v3 = vld [vmem:[%s4874_s16] ss:$0 sm:$0xff]  ;;  %s4452_s16 = scalar_lea.vmem %s3281_s29, 128 }
 0x778   :  { %3702 = vmatprep.subr.bf16.mxu1 %v4206_v25  ;;  %p4453_p10 = scmp.ne.s32.totalorder %s3281_s29, %s4452_s16  ;;  %p4458_p12 = scmp.lt.s32.totalorder %s4452_s16, %s4452_s16 }
 0x77a   :  { %p4459_p13 = por %p4458_p12, %p4457_p11 }
 0x77b   :  { %3703 = vmatpush3.bf16.msra.mxu1 %v4207_v41 }
 0x77c   :  { %3704 = vmatprep.subr.bf16.mxu1 %v4208_v26  ;;  %v3269_v26 = vand.u32 127, %v206_v38  ;;  %p4460_p0 = pnand %p4459_p13, %p4453_p10 }
 0x77e   :  { %vm3270_vm3 = vcmp.lt.s32.totalorder %v3269_v26, 8 }
 0x77f   :  { %3705 = vmatpush3.bf16.msra.mxu1 %v4209_v22 }
 0x780   :  { %3706 = vmatprep.subr.bf16.mxu1 %v4210_v0 }
 0x783   :  { %3707 = vmatpush3.bf16.msra.mxu1 %v4211_v28 }
 0x784   :  { %3714 = vmatprep.subr.bf16.mxu1 %v4212_v29 }
 0x839   :  { %v2859_v34 = vpop.f32.mrb[28].mxu1  ;;  %v2902_v35 = vpop.f32.mrb[16].mxu0 }
 0x83a   :  { %v2860_v36 = vadd.f32 %v2859_v34, %v2484_v30  ;;  %v2903_v37 = vadd.f32 %v2902_v35, %v2492_v31  ;;  %v2861_v44 = vpop.f32.mrb[29].mxu1  ;;  %v2904_v45 = vpop.f32.mrb[17].mxu0 }
 0x83b   :  { %v2862_v46 = vadd.f32 %v2861_v44, %v2488_v32  ;;  %v2905_v47 = vadd.f32 %v2904_v45, %v2496_v33  ;;  %v2863_v48 = vpop.f32.mrb[30].mxu1  ;;  %v2906_v49 = vpop.f32.mrb[18].mxu0 }
 0x83c   :  { %v2864_v50 = vadd.f32 %v2863_v48, %v2484_v30  ;;  %v2907_v51 = vadd.f32 %v2906_v49, %v2492_v31  ;;  %v2865_v52 = vpop.f32.mrb[31].mxu1  ;;  %v2908_v40 = vpop.f32.mrb[19].mxu0  ;;  %v2911_v53 = vmax.f32 %v2860_v36, 0.0  ;;  %v2913_v42 = vmax.f32 %v2903_v37, 0.0 }
 0x83d   :  { %v2866_v24 = vadd.f32 %v2865_v52, %v2488_v32  ;;  %v2909_v7 = vadd.f32 %v2908_v40, %v2496_v33  ;;  %v2912_v56 = vmax.f32 %v2862_v46, 0.0  ;;  %v2914_v57 = vmax.f32 %v2905_v47, 0.0 }
 0x83e   :  { %v2915_v55 = vmax.f32 %v2864_v50, 0.0  ;;  %v2917_v43 = vmax.f32 %v2907_v51, 0.0 }
 0x83f   :  { %v2916_v58 = vmax.f32 %v2866_v24, 0.0  ;;  %v2918_v59 = vmax.f32 %v2909_v7, 0.0 }
 0x840   :  { %v2919_v60 = vpack.c.bf16 %v2915_v55, %v2911_v53  ;;  %v2921_v61 = vpack.c.bf16 %v2917_v43, %v2913_v42 }
 0x841   :  { %v2920_v62 = vpack.c.bf16 %v2916_v58, %v2912_v56  ;;  %v2922_v63 = vpack.c.bf16 %v2918_v59, %v2914_v57 }
 0x843   :  { %3218 = vmatprep.mubr.bf16.mxu1 %v2920_v62 }
 0x844   :  { %3219 = vmatmul.mubr.bf16.vlgmr.msra.gmra.mrb[32].mxu1 %v2919_v60 }
 0x845   :  { %3715 = vmatpush3.bf16.msra.mxu1 %v4213_v1  ;;  %3259 = vmatprep.mubr.bf16.mxu1 %v2922_v63 }
 0x846   :  { %3716 = vmatprep.subr.bf16.mxu1 %v4214_v2 }
 0x849   :  { %3717 = vmatpush3.bf16.msra.mxu1 %v4215_v4 }
 0x84a   :  { %3718 = vmatprep.subr.bf16.mxu1 %v4216_v5 }
 0x84d   :  { %3719 = vmatpush3.bf16.msra.mxu1 %v4217_v6 }
 0x84e   :  { %3720 = vmatprep.subr.bf16.mxu1 %v4218_v8 }
 0x851   :  { %3721 = vmatpush3.bf16.msra.mxu1 %v4219_v9 }
 0x852   :  { %3722 = vmatprep.subr.bf16.mxu1 %v4220_v10 }
 0x855   :  { %3723 = vmatpush3.bf16.msra.mxu1 %v4221_v11 }
 0x856   :  { %3724 = vmatprep.subr.bf16.mxu1 %v4222_v12 }
 0x859   :  { %3725 = vmatpush3.bf16.msra.mxu1 %v4223_v14 }
 0x85a   :  { %3726 = vmatprep.subr.bf16.mxu1 %v4224_v39 }
 0x85d   :  { %3727 = vmatpush3.bf16.msra.mxu1 %v4225_v15 }
 0x85e   :  { %3728 = vmatprep.subr.bf16.mxu1 %v4226_v16 }
 0x861   :  { %3729 = vmatpush3.bf16.msra.mxu1 %v4227_v18 }
 0x864   :  { %3260 = vmatmul.mubr.bf16.vlgmr.msra.gmra.mrb[36].mxu1 %v2921_v61 }
 0x917   :  { %v3708_v13 = vpop.f32.mrb[32].mxu1 }
 0x918   :  { %v3709_v17 = vpop.f32.mrb[33].mxu1 }
 0x919   :  { %v3710_v19 = vadd.f32 %v3709_v17, %v3708_v13  ;;  %v3711_v20 = vpop.f32.mrb[34].mxu1 }
 0x91a   :  { %v3712_v21 = vpop.f32.mrb[35].mxu1 }
 0x91b   :  { %v3713_v23 = vadd.f32 %v3712_v21, %v3711_v20  ;;  %v3221_v22 = vadd.f32 %v3710_v19, %v3613_v3 }
 0x91d   :  { %v3224_v54 = vadd.f32 %v3713_v23, %v3613_v3 }
 0x937   :  { %v3730_v25 = vpop.f32.mrb[36].mxu1 }
 0x938   :  { %v3731_v41 = vpop.f32.mrb[37].mxu1 }
 0x939   :  { %v3732_v0 = vadd.f32 %v3731_v41, %v3730_v25  ;;  %v3733_v28 = vpop.f32.mrb[38].mxu1 }
 0x93a   :  { %v3734_v29 = vpop.f32.mrb[39].mxu1 }
 0x93b   :  { %v3262_v30 = vadd.f32 %v3732_v0, %v3221_v22  ;;  %v3735_v31 = vadd.f32 %v3734_v29, %v3733_v28 }
 0x93d   :  { %v3265_v32 = vadd.f32 %v3735_v31, %v3224_v54 }
 0x93f   :  { %v3271_v33 = vsel %vm3270_vm3, %v3262_v30, %v3265_v32 }
 0x940   :  { %v3272_v34 = vadd.f32 %v3271_v33, %v4821_v27 }
 0x942   :  { %3273 = vst [vmem:[#allocation19] sm:$0xff] %v3272_v34 }
 0x943   :  { %4463 = shalt.err (!%p4460_p0)
}
 0x944   :  { %s4884_s7 = sld [smem:[#allocation29_spill]] }
 0x94a   :  { %s4464_s19 = scalar_lea.hbm %s4884_s7, 128 }
 0x94b   :  { %p4465_p1 = scmp.ne.s32.totalorder %s4884_s7, %s4464_s19  ;;  %p4468_p2 = scmp.lt.u32.totalorder %s4464_s19, %s4884_s7 }
 0x94d   :  { %p4470_p3 = pnand %p4468_p2, %p4465_p1 }
 0x94f   :  { %4473 = shalt.err (!%p4470_p3)
}
 0x950   :  { %3283 = dma.vmem_to_hbm [thread:$0]  %s3281_s29, 128, %s4884_s7, [#allocation4]  }
 0x951   :  { %4486 = dma.done.wait [#allocation4], 128  }
 0x952   :  { %4487 = vsyncadd [#allocation4], 4294967168 }
 0x953   :  { %3287 = vsyncpa [#allocation3], 1 }
 0x954   :  { %3288 = vsyncpa [#allocation6], 1 }
 0x955   :  { %3289 = vsyncpa [#allocation9], 1 }
 0x956   :  { %3290 = vsyncpa [#allocation12], 1 }
 0x957   :  { %3291 = vsyncpa [#allocation15], 1 }
 0x958   :  { %3292 = vsyncpa [#allocation18], 1 }
 0x959   :  { %3293 = vsyncpa [#allocation4], 1 }

</bundles_post_ra>
